<compile_context>
chip_gen: v7x
topology: tpu7x:2x2x1
jax: 0.10.0
libtpu: 0.0.40
codegen_flags: <defaults>
</compile_context>

<pallas_src>
import functools

import jax
import jax.numpy as jnp
from jax import lax
from jax.experimental import pallas as pl
from jax.experimental.pallas import tpu as pltpu


def _round_up(v, m):
    return ((v + m - 1) // m) * m


def _gated_graph_conv_kernel(a_ref, x_ref, invdeg_ref, ctx_ref, proto_ref,
                             p2_ref, w2_ref, b_ref, o_ref, *, n_prototypes):
    """One node-tile of LinearGatedGraphConvProto.forward."""
    # --- 1. mean neighborhood aggregation ------------------------------------
    # int8 0/1(/count) adjacency -> bf16 (exact for small counts) for the MXU;
    # 1/deg row scale applied in f32 afterwards (no bf16 rounding of weights).
    a_bf = a_ref[...].astype(jnp.bfloat16)                        # (tile_n, n_pad)
    agg = jnp.dot(a_bf, x_ref[...],
                  preferred_element_type=jnp.float32)             # (tile_n, C)
    agg = agg * invdeg_ref[...]                                   # f32 (tile_n, 1)

    # --- 2. prototype gating: argmin squared-L2, first-index tie-break -------
    ctx = ctx_ref[...]                                            # (tile_n, T) f32
    protos = proto_ref[...]                                       # (P, T)      f32
    cp = lax.dot_general(ctx, protos,
                         dimension_numbers=(((1,), (1,)), ((), ())),
                         precision=lax.Precision.HIGHEST,         # keep f32 ties
                         preferred_element_type=jnp.float32)      # (tile_n, P)
    # ||c||^2 is constant per node -> irrelevant for argmin; ||p||^2 prefed.
    dist = p2_ref[...] - 2.0 * cp                                 # (tile_n, P)
    dmin = jnp.min(dist, axis=-1, keepdims=True)                  # (tile_n, 1)
    iota_p = lax.broadcasted_iota(jnp.int32, dist.shape, 1)       # (tile_n, P)
    first_idx = jnp.min(jnp.where(dist == dmin, iota_p, n_prototypes),
                        axis=-1, keepdims=True)                   # (tile_n, 1)

    # --- 3. gated-LHS linear map: ONE matmul with output width Kp ------------
    # gated_lhs[:, p*C:(p+1)*C] = agg * (first_idx == p); W2 is (P*C, Kp), so
    # only the selected prototype's weights contribute to the result.
    agg_bf = agg.astype(jnp.bfloat16)
    parts = [jnp.where(first_idx == pi, agg_bf, 0.0)
             for pi in range(n_prototypes)]                       # each (tile_n, C)
    gated_lhs = jnp.concatenate(parts, axis=-1)                   # (tile_n, P*C)
    h = jnp.dot(gated_lhs, w2_ref[...],
                preferred_element_type=jnp.float32)               # (tile_n, Kp)

    onehot = (iota_p == first_idx).astype(jnp.float32)            # (tile_n, P)
    b_sel = lax.dot_general(onehot, b_ref[...],
                            dimension_numbers=(((1,), (0,)), ((), ())),
                            precision=lax.Precision.HIGHEST,
                            preferred_element_type=jnp.float32)   # (tile_n, Kp)
    o_ref[...] = h + b_sel


def mp_class_layer_forward(x, context, edge_index, prototypes, weights, bias,
                           *, tile_n_max=None):
    """MP_ClassLayer.forward == LinearGatedGraphConvProto(X, context, edge_index)."""
    n, c = x.shape
    n_proto, t = prototypes.shape
    k = weights.shape[-1]
    kp = _round_up(k, 128)                         # lane-dense output width

    # --- device-aware limits ---------------------------------------------------
    try:
        info = pltpu.get_tpu_info()
        vmem_cap = int(getattr(info, "vmem_capacity_bytes", 64 * 1024 * 1024))
    except Exception:                              # be robust off-TPU / old jax
        vmem_cap = 64 * 1024 * 1024
    if tile_n_max is None:
        # 512 on 128-MiB-VMEM parts (v5e/v6e), 256 on 64-MiB v7x.
        tile_n_max = 512 if vmem_cap >= (100 << 20) else 256

    # --- node-axis tiling (int8 adjacency -> 32-sublane granularity) ----------
    sub = 32
    n_min = _round_up(n, sub)
    tile_n = min(tile_n_max, n_min)
    if n_min > sub:                                # >=2 grid steps -> both v7x TCs
        tile_n = min(tile_n, _round_up((n_min + 1) // 2, sub))
    tile_n = max(tile_n, sub)

    def _budget(tn):
        npd = _round_up(n, tn)
        stream = 2 * (tn * npd * 1            # int8 A block (double-buffered)
                      + tn * t * 4            # context block
                      + tn * 4                # 1/deg block
                      + tn * kp * 4)          # output block
        resident = (npd * c * 2 + n_proto * t * 4 + n_proto * 4
                    + n_proto * c * kp * 2 + n_proto * kp * 4)
        temps = (tn * npd * 2                 # bf16 cast of A block
                 + tn * c * 12                # agg f32 + bf16 + gated parts
                 + tn * n_proto * 16          # cp / dist / iota / onehot
                 + tn * n_proto * c * 2       # gated_lhs bf16
                 + tn * kp * 12)              # h, b_sel, sum (f32)
        return stream + resident + temps

    while tile_n > sub and _budget(tile_n) > 0.4 * vmem_cap:
        tile_n -= sub
    n_pad = _round_up(n, tile_n)
    vmem_limit = int(min(0.85 * vmem_cap, max(2 * _budget(tile_n), 32 << 20)))

    # --- adjacency built DIRECTLY in int8 (no f32 N x N materialize) ----------
    src = edge_index[0].astype(jnp.int32)
    dst = edge_index[1].astype(jnp.int32)
    self_idx = jnp.arange(n, dtype=jnp.int32)
    rows = jnp.concatenate([dst, self_idx])
    cols = jnp.concatenate([src, self_idx])
    # Counts (duplicate edges accumulate, matching the reference); small counts
    # are exact in int8 and in the in-kernel bf16 cast.
    a_i8 = jnp.zeros((n_pad, n_pad), jnp.int8).at[rows, cols].add(jnp.int8(1))
    # deg = 1 (self loop) + in-degree; padded rows get deg=1 (avoids inf/NaN).
    deg = jnp.ones((n_pad,), jnp.float32).at[dst].add(1.0)
    inv_deg = (1.0 / deg).reshape(n_pad, 1)

    x_bf = jnp.pad(x, ((0, n_pad - n), (0, 0))).astype(jnp.bfloat16)
    ctx_p = jnp.pad(context, ((0, n_pad - n), (0, 0))).astype(jnp.float32)

    # --- parameter re-layout for the gated-LHS matmul -------------------------
    w_pad = jnp.pad(weights, ((0, 0), (0, 0), (0, kp - k)))        # (P, C, Kp)
    w2_bf = w_pad.reshape(n_proto * c, kp).astype(jnp.bfloat16)    # (P*C, Kp)
    b_pad = jnp.pad(bias, ((0, 0), (0, kp - k))).astype(jnp.float32)  # (P, Kp)
    p2 = jnp.sum(prototypes * prototypes, axis=-1).reshape(1, n_proto)
    protos_f32 = prototypes.astype(jnp.float32)

    grid = (n_pad // tile_n,)
    kernel = functools.partial(_gated_graph_conv_kernel, n_prototypes=n_proto)

    flops = (2 * n_pad * n_pad * c
             + 2 * n_pad * t * n_proto
             + 2 * n_pad * (n_proto * c) * kp
             + 2 * n_pad * n_proto * kp)
    bytes_acc = (n_pad * n_pad                  # int8 adjacency
                 + n_pad * c * 2 + n_pad * t * 4 + n_pad * 4
                 + n_proto * t * 4 + n_proto * 4
                 + n_proto * c * kp * 2 + n_proto * kp * 4
                 + n_pad * kp * 4)

    def _call(single_buffer_residents):
        res_kw = ({"pipeline_mode": pl.Buffered(1)}
                  if single_buffer_residents else {})
        grid_spec = pltpu.PrefetchScalarGridSpec(
            num_scalar_prefetch=0,
            grid=grid,
            in_specs=[
                pl.BlockSpec((tile_n, n_pad), lambda i: (i, 0)),             # A (int8) row block
                pl.BlockSpec((n_pad, c), lambda i: (0, 0), **res_kw),        # X (resident)
                pl.BlockSpec((tile_n, 1), lambda i: (i, 0)),                 # 1/deg block
                pl.BlockSpec((tile_n, t), lambda i: (i, 0)),                 # context block
                pl.BlockSpec((n_proto, t), lambda i: (0, 0), **res_kw),      # prototypes
                pl.BlockSpec((1, n_proto), lambda i: (0, 0), **res_kw),      # ||p||^2
                pl.BlockSpec((n_proto * c, kp), lambda i: (0, 0), **res_kw), # W2 (P*C, Kp)
                pl.BlockSpec((n_proto, kp), lambda i: (0, 0), **res_kw),     # bias (P, Kp)
            ],
            out_specs=pl.BlockSpec((tile_n, kp), lambda i: (i, 0)),
        )
        return pl.pallas_call(
            kernel,
            out_shape=jax.ShapeDtypeStruct((n_pad, kp), jnp.float32),
            grid_spec=grid_spec,
            compiler_params=pltpu.CompilerParams(
                dimension_semantics=("parallel",),
                vmem_limit_bytes=vmem_limit),
            cost_estimate=pl.CostEstimate(flops=int(flops), transcendentals=0,
                                          bytes_accessed=int(bytes_acc)),
        )(a_i8, x_bf, inv_deg, ctx_p, protos_f32, p2, w2_bf, b_pad)

    try:
        out = _call(True)
    except Exception:
        # Older JAX without BlockSpec(pipeline_mode=...) / Buffered(1) support.
        out = _call(False)

    # Padded rows carry bias of their (meaningless) nearest prototype; slice.
    return out[:n, :k]


def _reference(x, context, edge_index, prototypes, weights, bias):
    n = x.shape[0]
    src, dst = edge_index[0], edge_index[1]
    a = jnp.zeros((n, n), jnp.float32).at[dst, src].add(1.0)
    a = a + jnp.eye(n, dtype=jnp.float32)
    a_hat = a / jnp.sum(a, axis=1, keepdims=True)
    agg = a_hat @ x
    dist = jnp.sum((context[:, None, :] - prototypes[None, :, :]) ** 2, axis=-1)
    g = jnp.argmin(dist, axis=-1)
    w_sel = weights[g]            # (N, C, K)
    b_sel = bias[g]               # (N, K)
    return jnp.einsum("nc,nck->nk", agg, w_sel) + b_sel


if __name__ == "__main__":
    # Small shapes consistent with the module's ctor (>=2 node tiles on TPU).
    N = 48            # number of graph nodes
    IN_CHANNELS = 8
    N_NEURON = 32
    CONTEXT_DIM = 8
    N_PROTOTYPES = 4
    N_EDGES = 96

    key = jax.random.PRNGKey(0)
    kx, kc, ke, kpr, kw, kb = jax.random.split(key, 6)

    x = jax.random.normal(kx, (N, IN_CHANNELS), jnp.float32)
    context = jax.random.normal(kc, (N, CONTEXT_DIM), jnp.float32)
    edge_index = jax.random.randint(ke, (2, N_EDGES), 0, N, jnp.int32)

    # Deterministic parameter init (reset_parameters / set_prototypes stand-in).
    prototypes = jax.random.normal(kpr, (N_PROTOTYPES, CONTEXT_DIM), jnp.float32)
    weights = jax.random.normal(
        kw, (N_PROTOTYPES, IN_CHANNELS, N_NEURON), jnp.float32) * 0.1
    bias = jax.random.normal(kb, (N_PROTOTYPES, N_NEURON), jnp.float32) * 0.01

    h = mp_class_layer_forward(x, context, edge_index, prototypes, weights, bias)
    h = jax.block_until_ready(h)

    h_ref = _reference(x, context, edge_index, prototypes, weights, bias)
    assert h.shape == (N, N_NEURON)
    # bf16 MXU inputs (X / agg / W); aggregation normalization & bias stay f32.
    assert jnp.allclose(h, h_ref, atol=3e-2, rtol=3e-2), "mismatch vs reference"

    print("KERNEL_OK")
</pallas_src>

<mosaic_0001>
module attributes {stable_mosaic.version = 11 : i64} {
  func.func @_gated_graph_conv_kernel(%arg0: i32, %arg1: memref<32x64xi8, #tpu.memory_space<vmem>>, %arg2: memref<64x8xbf16, #tpu.memory_space<vmem>>, %arg3: memref<32x1xf32, #tpu.memory_space<vmem>>, %arg4: memref<32x8xf32, #tpu.memory_space<vmem>>, %arg5: memref<4x8xf32, #tpu.memory_space<vmem>>, %arg6: memref<1x4xf32, #tpu.memory_space<vmem>>, %arg7: memref<32x128xbf16, #tpu.memory_space<vmem>>, %arg8: memref<4x128xf32, #tpu.memory_space<vmem>>, %arg9: memref<32x128xf32, #tpu.memory_space<vmem>>) attributes {dimension_semantics = [#tpu.dimension_semantics<parallel>], iteration_bounds = array<i64: 2>, scalar_prefetch = 0 : i64, scratch_operands = 0 : i64, tpu.core_type = #tpu.core_type<tc>, window_params = [{transform_indices = @transform_0, window_bounds = array<i64: 32, 64>}, {pipeline_mode = #tpu.pipeline_mode<synchronous>, transform_indices = @transform_1, window_bounds = array<i64: 64, 8>}, {transform_indices = @transform_2, window_bounds = array<i64: 32, 1>}, {transform_indices = @transform_3, window_bounds = array<i64: 32, 8>}, {pipeline_mode = #tpu.pipeline_mode<synchronous>, transform_indices = @transform_4, window_bounds = array<i64: 4, 8>}, {pipeline_mode = #tpu.pipeline_mode<synchronous>, transform_indices = @transform_5, window_bounds = array<i64: 1, 4>}, {pipeline_mode = #tpu.pipeline_mode<synchronous>, transform_indices = @transform_6, window_bounds = array<i64: 32, 128>}, {pipeline_mode = #tpu.pipeline_mode<synchronous>, transform_indices = @transform_7, window_bounds = array<i64: 4, 128>}, {transform_indices = @transform_8, window_bounds = array<i64: 32, 128>}]} {
    %c0 = arith.constant 0 : index
    %c0_0 = arith.constant 0 : index
    %0 = vector.load %arg1[%c0, %c0_0] : memref<32x64xi8, #tpu.memory_space<vmem>>, vector<32x64xi8>
    %1 = arith.sitofp %0 : vector<32x64xi8> to vector<32x64xbf16>
    %c0_1 = arith.constant 0 : index
    %c0_2 = arith.constant 0 : index
    %2 = vector.load %arg2[%c0_1, %c0_2] : memref<64x8xbf16, #tpu.memory_space<vmem>>, vector<64x8xbf16>
    %cst = arith.constant dense<0.000000e+00> : vector<32x8xf32>
    %3 = tpu.matmul %1, %2, %cst {dimension_numbers = #tpu.dot_dimension_numbers<[1], [0], [0], [1], [0, 0, 1, 1], [], []>} : vector<32x64xbf16>, vector<64x8xbf16>, vector<32x8xf32> -> vector<32x8xf32>
    %c0_3 = arith.constant 0 : index
    %c0_4 = arith.constant 0 : index
    %4 = vector.load %arg3[%c0_3, %c0_4] : memref<32x1xf32, #tpu.memory_space<vmem>>, vector<32x1xf32>
    %5 = vector.broadcast %4 : vector<32x1xf32> to vector<32x8xf32>
    %6 = arith.mulf %3, %5 : vector<32x8xf32>
    %c0_5 = arith.constant 0 : index
    %c0_6 = arith.constant 0 : index
    %7 = vector.load %arg4[%c0_5, %c0_6] : memref<32x8xf32, #tpu.memory_space<vmem>>, vector<32x8xf32>
    %c0_7 = arith.constant 0 : index
    %c0_8 = arith.constant 0 : index
    %8 = vector.load %arg5[%c0_7, %c0_8] : memref<4x8xf32, #tpu.memory_space<vmem>>, vector<4x8xf32>
    %cst_9 = arith.constant dense<0.000000e+00> : vector<32x4xf32>
    %9 = tpu.matmul %7, %8, %cst_9 {dimension_numbers = #tpu.dot_dimension_numbers<[1], [1], [0], [0], [0, 0, 1, 0], [], []>, precision = #tpu.contract_precision<fp32>} : vector<32x8xf32>, vector<4x8xf32>, vector<32x4xf32> -> vector<32x4xf32>
    %c0_10 = arith.constant 0 : index
    %c0_11 = arith.constant 0 : index
    %10 = vector.load %arg6[%c0_10, %c0_11] : memref<1x4xf32, #tpu.memory_space<vmem>>, vector<1x4xf32>
    %cst_12 = arith.constant 2.000000e+00 : f32
    %11 = vector.broadcast %cst_12 : f32 to vector<32x4xf32>
    %12 = arith.mulf %11, %9 : vector<32x4xf32>
    %13 = vector.broadcast %10 : vector<1x4xf32> to vector<32x4xf32>
    %14 = arith.subf %13, %12 : vector<32x4xf32>
    %cst_13 = arith.constant dense<0x7F800000> : vector<32xf32>
    %15 = vector.multi_reduction <minimumf>, %14, %cst_13 [1] : vector<32x4xf32> to vector<32xf32>
    %16 = vector.shape_cast %15 : vector<32xf32> to vector<32x1xf32>
    %17 = tpu.iota {dimensions = array<i32: 1>} : vector<32x4xi32>
    %18 = vector.broadcast %16 : vector<32x1xf32> to vector<32x4xf32>
    %19 = arith.cmpf oeq, %14, %18 : vector<32x4xf32>
    %c4_i32 = arith.constant 4 : i32
    %20 = vector.broadcast %c4_i32 : i32 to vector<32x4xi32>
    %21 = arith.select %19, %17, %20 : vector<32x4xi1>, vector<32x4xi32>
    %cst_14 = arith.constant dense<2147483647> : vector<32xi32>
    %22 = vector.multi_reduction <minsi>, %21, %cst_14 [1] : vector<32x4xi32> to vector<32xi32>
    %23 = vector.shape_cast %22 : vector<32xi32> to vector<32x1xi32>
    %24 = arith.truncf %6 : vector<32x8xf32> to vector<32x8xbf16>
    %c0_i32 = arith.constant 0 : i32
    %25 = vector.broadcast %c0_i32 : i32 to vector<32x1xi32>
    %26 = arith.cmpi eq, %23, %25 : vector<32x1xi32>
    %cst_15 = arith.constant 0.000000e+00 : f32
    %27 = arith.truncf %cst_15 : f32 to bf16
    %28 = vector.shape_cast %26 : vector<32x1xi1> to vector<32x1xi1>
    %29 = vector.broadcast %28 : vector<32x1xi1> to vector<32x8xi1>
    %30 = vector.broadcast %27 : bf16 to vector<32x8xbf16>
    %31 = arith.select %29, %24, %30 : vector<32x8xi1>, vector<32x8xbf16>
    %c1_i32 = arith.constant 1 : i32
    %32 = vector.broadcast %c1_i32 : i32 to vector<32x1xi32>
    %33 = arith.cmpi eq, %23, %32 : vector<32x1xi32>
    %cst_16 = arith.constant 0.000000e+00 : f32
    %34 = arith.truncf %cst_16 : f32 to bf16
    %35 = vector.shape_cast %33 : vector<32x1xi1> to vector<32x1xi1>
    %36 = vector.broadcast %35 : vector<32x1xi1> to vector<32x8xi1>
    %37 = vector.broadcast %34 : bf16 to vector<32x8xbf16>
    %38 = arith.select %36, %24, %37 : vector<32x8xi1>, vector<32x8xbf16>
    %c2_i32 = arith.constant 2 : i32
    %39 = vector.broadcast %c2_i32 : i32 to vector<32x1xi32>
    %40 = arith.cmpi eq, %23, %39 : vector<32x1xi32>
    %cst_17 = arith.constant 0.000000e+00 : f32
    %41 = arith.truncf %cst_17 : f32 to bf16
    %42 = vector.shape_cast %40 : vector<32x1xi1> to vector<32x1xi1>
    %43 = vector.broadcast %42 : vector<32x1xi1> to vector<32x8xi1>
    %44 = vector.broadcast %41 : bf16 to vector<32x8xbf16>
    %45 = arith.select %43, %24, %44 : vector<32x8xi1>, vector<32x8xbf16>
    %c3_i32 = arith.constant 3 : i32
    %46 = vector.broadcast %c3_i32 : i32 to vector<32x1xi32>
    %47 = arith.cmpi eq, %23, %46 : vector<32x1xi32>
    %cst_18 = arith.constant 0.000000e+00 : f32
    %48 = arith.truncf %cst_18 : f32 to bf16
    %49 = vector.shape_cast %47 : vector<32x1xi1> to vector<32x1xi1>
    %50 = vector.broadcast %49 : vector<32x1xi1> to vector<32x8xi1>
    %51 = vector.broadcast %48 : bf16 to vector<32x8xbf16>
    %52 = arith.select %50, %24, %51 : vector<32x8xi1>, vector<32x8xbf16>
    %53 = tpu.concatenate %31, %38, %45, %52 in 1 : vector<32x8xbf16>, vector<32x8xbf16>, vector<32x8xbf16>, vector<32x8xbf16> -> vector<32x32xbf16>
    %c0_19 = arith.constant 0 : index
    %c0_20 = arith.constant 0 : index
    %54 = vector.load %arg7[%c0_19, %c0_20] : memref<32x128xbf16, #tpu.memory_space<vmem>>, vector<32x128xbf16>
    %cst_21 = arith.constant dense<0.000000e+00> : vector<32x128xf32>
    %55 = tpu.matmul %53, %54, %cst_21 {dimension_numbers = #tpu.dot_dimension_numbers<[1], [0], [0], [1], [0, 0, 1, 1], [], []>} : vector<32x32xbf16>, vector<32x128xbf16>, vector<32x128xf32> -> vector<32x128xf32>
    %56 = vector.broadcast %23 : vector<32x1xi32> to vector<32x4xi32>
    %57 = arith.cmpi eq, %17, %56 : vector<32x4xi32>
    %58 = arith.extui %57 : vector<32x4xi1> to vector<32x4xi32>
    %59 = arith.sitofp %58 : vector<32x4xi32> to vector<32x4xf32>
    %c0_22 = arith.constant 0 : index
    %c0_23 = arith.constant 0 : index
    %60 = vector.load %arg8[%c0_22, %c0_23] : memref<4x128xf32, #tpu.memory_space<vmem>>, vector<4x128xf32>
    %cst_24 = arith.constant dense<0.000000e+00> : vector<32x128xf32>
    %61 = tpu.matmul %59, %60, %cst_24 {dimension_numbers = #tpu.dot_dimension_numbers<[1], [0], [0], [1], [0, 0, 1, 1], [], []>, precision = #tpu.contract_precision<fp32>} : vector<32x4xf32>, vector<4x128xf32>, vector<32x128xf32> -> vector<32x128xf32>
    %62 = arith.addf %55, %61 : vector<32x128xf32>
    %c0_25 = arith.constant 0 : index
    %c0_26 = arith.constant 0 : index
    %63 = vector.load %arg9[%c0_25, %c0_26] : memref<32x128xf32, #tpu.memory_space<vmem>>, vector<32x128xf32>
    tpu.vector_store %arg9[%c0_25, %c0_26], %62 {strides = array<i32>} : memref<32x128xf32, #tpu.memory_space<vmem>>, vector<32x128xf32>,
    return
  }
  func.func @transform_0(%arg0: i32) -> (i32, i32) {
    %c0_i32 = arith.constant 0 : i32
    %c0_i32_0 = arith.constant 0 : i32
    return %arg0, %c0_i32 : i32, i32
  }
  func.func @transform_1(%arg0: i32) -> (i32, i32) {
    %c0_i32 = arith.constant 0 : i32
    %c0_i32_0 = arith.constant 0 : i32
    %c0_i32_1 = arith.constant 0 : i32
    return %c0_i32, %c0_i32_0 : i32, i32
  }
  func.func @transform_2(%arg0: i32) -> (i32, i32) {
    %c0_i32 = arith.constant 0 : i32
    %c0_i32_0 = arith.constant 0 : i32
    return %arg0, %c0_i32 : i32, i32
  }
  func.func @transform_3(%arg0: i32) -> (i32, i32) {
    %c0_i32 = arith.constant 0 : i32
    %c0_i32_0 = arith.constant 0 : i32
    return %arg0, %c0_i32 : i32, i32
  }
  func.func @transform_4(%arg0: i32) -> (i32, i32) {
    %c0_i32 = arith.constant 0 : i32
    %c0_i32_0 = arith.constant 0 : i32
    %c0_i32_1 = arith.constant 0 : i32
    return %c0_i32, %c0_i32_0 : i32, i32
  }
  func.func @transform_5(%arg0: i32) -> (i32, i32) {
    %c0_i32 = arith.constant 0 : i32
    %c0_i32_0 = arith.constant 0 : i32
    %c0_i32_1 = arith.constant 0 : i32
    return %c0_i32, %c0_i32_0 : i32, i32
  }
  func.func @transform_6(%arg0: i32) -> (i32, i32) {
    %c0_i32 = arith.constant 0 : i32
    %c0_i32_0 = arith.constant 0 : i32
    %c0_i32_1 = arith.constant 0 : i32
    return %c0_i32, %c0_i32_0 : i32, i32
  }
  func.func @transform_7(%arg0: i32) -> (i32, i32) {
    %c0_i32 = arith.constant 0 : i32
    %c0_i32_0 = arith.constant 0 : i32
    %c0_i32_1 = arith.constant 0 : i32
    return %c0_i32, %c0_i32_0 : i32, i32
  }
  func.func @transform_8(%arg0: i32) -> (i32, i32) {
    %c0_i32 = arith.constant 0 : i32
    %c0_i32_0 = arith.constant 0 : i32
    return %arg0, %c0_i32 : i32, i32
  }
}

module attributes {stable_mosaic.version = 11 : i64} {
  func.func @_gated_graph_conv_kernel(%arg0: i32, %arg1: memref<32x64xi8, #tpu.memory_space<vmem>>, %arg2: memref<64x8xbf16, #tpu.memory_space<vmem>>, %arg3: memref<32x1xf32, #tpu.memory_space<vmem>>, %arg4: memref<32x8xf32, #tpu.memory_space<vmem>>, %arg5: memref<4x8xf32, #tpu.memory_space<vmem>>, %arg6: memref<1x4xf32, #tpu.memory_space<vmem>>, %arg7: memref<32x128xbf16, #tpu.memory_space<vmem>>, %arg8: memref<4x128xf32, #tpu.memory_space<vmem>>, %arg9: memref<32x128xf32, #tpu.memory_space<vmem>>) attributes {dimension_semantics = [#tpu.dimension_semantics<parallel>], iteration_bounds = array<i64: 2>, scalar_prefetch = 0 : i64, scratch_operands = 0 : i64, tpu.core_type = #tpu.core_type<tc>, window_params = [{transform_indices = @transform_0, window_bounds = array<i64: 32, 64>}, {pipeline_mode = #tpu.pipeline_mode<synchronous>, transform_indices = @transform_1, window_bounds = array<i64: 64, 8>}, {transform_indices = @transform_2, window_bounds = array<i64: 32, 1>}, {transform_indices = @transform_3, window_bounds = array<i64: 32, 8>}, {pipeline_mode = #tpu.pipeline_mode<synchronous>, transform_indices = @transform_4, window_bounds = array<i64: 4, 8>}, {pipeline_mode = #tpu.pipeline_mode<synchronous>, transform_indices = @transform_5, window_bounds = array<i64: 1, 4>}, {pipeline_mode = #tpu.pipeline_mode<synchronous>, transform_indices = @transform_6, window_bounds = array<i64: 32, 128>}, {pipeline_mode = #tpu.pipeline_mode<synchronous>, transform_indices = @transform_7, window_bounds = array<i64: 4, 128>}, {transform_indices = @transform_8, window_bounds = array<i64: 32, 128>}]} {
    %c0 = arith.constant 0 : index
    %c0_0 = arith.constant 0 : index
    %0 = vector.load %arg1[%c0, %c0_0] : memref<32x64xi8, #tpu.memory_space<vmem>>, vector<32x64xi8>
    %1 = arith.sitofp %0 : vector<32x64xi8> to vector<32x64xbf16>
    %c0_1 = arith.constant 0 : index
    %c0_2 = arith.constant 0 : index
    %2 = vector.load %arg2[%c0_1, %c0_2] : memref<64x8xbf16, #tpu.memory_space<vmem>>, vector<64x8xbf16>
    %cst = arith.constant dense<0.000000e+00> : vector<32x8xf32>
    %3 = tpu.matmul %1, %2, %cst {dimension_numbers = #tpu.dot_dimension_numbers<[1], [0], [0], [1], [0, 0, 1, 1], [], []>} : vector<32x64xbf16>, vector<64x8xbf16>, vector<32x8xf32> -> vector<32x8xf32>
    %c0_3 = arith.constant 0 : index
    %c0_4 = arith.constant 0 : index
    %4 = vector.load %arg3[%c0_3, %c0_4] : memref<32x1xf32, #tpu.memory_space<vmem>>, vector<32x1xf32>
    %5 = vector.broadcast %4 : vector<32x1xf32> to vector<32x8xf32>
    %6 = arith.mulf %3, %5 : vector<32x8xf32>
    %c0_5 = arith.constant 0 : index
    %c0_6 = arith.constant 0 : index
    %7 = vector.load %arg4[%c0_5, %c0_6] : memref<32x8xf32, #tpu.memory_space<vmem>>, vector<32x8xf32>
    %c0_7 = arith.constant 0 : index
    %c0_8 = arith.constant 0 : index
    %8 = vector.load %arg5[%c0_7, %c0_8] : memref<4x8xf32, #tpu.memory_space<vmem>>, vector<4x8xf32>
    %cst_9 = arith.constant dense<0.000000e+00> : vector<32x4xf32>
    %9 = tpu.matmul %7, %8, %cst_9 {dimension_numbers = #tpu.dot_dimension_numbers<[1], [1], [0], [0], [0, 0, 1, 0], [], []>, precision = #tpu.contract_precision<fp32>} : vector<32x8xf32>, vector<4x8xf32>, vector<32x4xf32> -> vector<32x4xf32>
    %c0_10 = arith.constant 0 : index
    %c0_11 = arith.constant 0 : index
    %10 = vector.load %arg6[%c0_10, %c0_11] : memref<1x4xf32, #tpu.memory_space<vmem>>, vector<1x4xf32>
    %cst_12 = arith.constant 2.000000e+00 : f32
    %11 = vector.broadcast %cst_12 : f32 to vector<32x4xf32>
    %12 = arith.mulf %11, %9 : vector<32x4xf32>
    %13 = vector.broadcast %10 : vector<1x4xf32> to vector<32x4xf32>
    %14 = arith.subf %13, %12 : vector<32x4xf32>
    %cst_13 = arith.constant dense<0x7F800000> : vector<32xf32>
    %15 = vector.multi_reduction <minimumf>, %14, %cst_13 [1] : vector<32x4xf32> to vector<32xf32>
    %16 = vector.shape_cast %15 : vector<32xf32> to vector<32x1xf32>
    %17 = tpu.iota {dimensions = array<i32: 1>} : vector<32x4xi32>
    %18 = vector.broadcast %16 : vector<32x1xf32> to vector<32x4xf32>
    %19 = arith.cmpf oeq, %14, %18 : vector<32x4xf32>
    %c4_i32 = arith.constant 4 : i32
    %20 = vector.broadcast %c4_i32 : i32 to vector<32x4xi32>
    %21 = arith.select %19, %17, %20 : vector<32x4xi1>, vector<32x4xi32>
    %cst_14 = arith.constant dense<2147483647> : vector<32xi32>
    %22 = vector.multi_reduction <minsi>, %21, %cst_14 [1] : vector<32x4xi32> to vector<32xi32>
    %23 = vector.shape_cast %22 : vector<32xi32> to vector<32x1xi32>
    %24 = arith.truncf %6 : vector<32x8xf32> to vector<32x8xbf16>
    %c0_i32 = arith.constant 0 : i32
    %25 = vector.broadcast %c0_i32 : i32 to vector<32x1xi32>
    %26 = arith.cmpi eq, %23, %25 : vector<32x1xi32>
    %cst_15 = arith.constant 0.000000e+00 : f32
    %27 = arith.truncf %cst_15 : f32 to bf16
    %28 = vector.shape_cast %26 : vector<32x1xi1> to vector<32x1xi1>
    %29 = vector.broadcast %28 : vector<32x1xi1> to vector<32x8xi1>
    %30 = vector.broadcast %27 : bf16 to vector<32x8xbf16>
    %31 = arith.select %29, %24, %30 : vector<32x8xi1>, vector<32x8xbf16>
    %c1_i32 = arith.constant 1 : i32
    %32 = vector.broadcast %c1_i32 : i32 to vector<32x1xi32>
    %33 = arith.cmpi eq, %23, %32 : vector<32x1xi32>
    %cst_16 = arith.constant 0.000000e+00 : f32
    %34 = arith.truncf %cst_16 : f32 to bf16
    %35 = vector.shape_cast %33 : vector<32x1xi1> to vector<32x1xi1>
    %36 = vector.broadcast %35 : vector<32x1xi1> to vector<32x8xi1>
    %37 = vector.broadcast %34 : bf16 to vector<32x8xbf16>
    %38 = arith.select %36, %24, %37 : vector<32x8xi1>, vector<32x8xbf16>
    %c2_i32 = arith.constant 2 : i32
    %39 = vector.broadcast %c2_i32 : i32 to vector<32x1xi32>
    %40 = arith.cmpi eq, %23, %39 : vector<32x1xi32>
    %cst_17 = arith.constant 0.000000e+00 : f32
    %41 = arith.truncf %cst_17 : f32 to bf16
    %42 = vector.shape_cast %40 : vector<32x1xi1> to vector<32x1xi1>
    %43 = vector.broadcast %42 : vector<32x1xi1> to vector<32x8xi1>
    %44 = vector.broadcast %41 : bf16 to vector<32x8xbf16>
    %45 = arith.select %43, %24, %44 : vector<32x8xi1>, vector<32x8xbf16>
    %c3_i32 = arith.constant 3 : i32
    %46 = vector.broadcast %c3_i32 : i32 to vector<32x1xi32>
    %47 = arith.cmpi eq, %23, %46 : vector<32x1xi32>
    %cst_18 = arith.constant 0.000000e+00 : f32
    %48 = arith.truncf %cst_18 : f32 to bf16
    %49 = vector.shape_cast %47 : vector<32x1xi1> to vector<32x1xi1>
    %50 = vector.broadcast %49 : vector<32x1xi1> to vector<32x8xi1>
    %51 = vector.broadcast %48 : bf16 to vector<32x8xbf16>
    %52 = arith.select %50, %24, %51 : vector<32x8xi1>, vector<32x8xbf16>
    %53 = tpu.concatenate %31, %38, %45, %52 in 1 : vector<32x8xbf16>, vector<32x8xbf16>, vector<32x8xbf16>, vector<32x8xbf16> -> vector<32x32xbf16>
    %c0_19 = arith.constant 0 : index
    %c0_20 = arith.constant 0 : index
    %54 = vector.load %arg7[%c0_19, %c0_20] : memref<32x128xbf16, #tpu.memory_space<vmem>>, vector<32x128xbf16>
    %cst_21 = arith.constant dense<0.000000e+00> : vector<32x128xf32>
    %55 = tpu.matmul %53, %54, %cst_21 {dimension_numbers = #tpu.dot_dimension_numbers<[1], [0], [0], [1], [0, 0, 1, 1], [], []>} : vector<32x32xbf16>, vector<32x128xbf16>, vector<32x128xf32> -> vector<32x128xf32>
    %56 = vector.broadcast %23 : vector<32x1xi32> to vector<32x4xi32>
    %57 = arith.cmpi eq, %17, %56 : vector<32x4xi32>
    %58 = arith.extui %57 : vector<32x4xi1> to vector<32x4xi32>
    %59 = arith.sitofp %58 : vector<32x4xi32> to vector<32x4xf32>
    %c0_22 = arith.constant 0 : index
    %c0_23 = arith.constant 0 : index
    %60 = vector.load %arg8[%c0_22, %c0_23] : memref<4x128xf32, #tpu.memory_space<vmem>>, vector<4x128xf32>
    %cst_24 = arith.constant dense<0.000000e+00> : vector<32x128xf32>
    %61 = tpu.matmul %59, %60, %cst_24 {dimension_numbers = #tpu.dot_dimension_numbers<[1], [0], [0], [1], [0, 0, 1, 1], [], []>, precision = #tpu.contract_precision<fp32>} : vector<32x4xf32>, vector<4x128xf32>, vector<32x128xf32> -> vector<32x128xf32>
    %62 = arith.addf %55, %61 : vector<32x128xf32>
    %c0_25 = arith.constant 0 : index
    %c0_26 = arith.constant 0 : index
    %63 = vector.load %arg9[%c0_25, %c0_26] : memref<32x128xf32, #tpu.memory_space<vmem>>, vector<32x128xf32>
    tpu.vector_store %arg9[%c0_25, %c0_26], %62 {strides = array<i32>} : memref<32x128xf32, #tpu.memory_space<vmem>>, vector<32x128xf32>,
    return
  }
  func.func @transform_0(%arg0: i32) -> (i32, i32) {
    %c0_i32 = arith.constant 0 : i32
    %c0_i32_0 = arith.constant 0 : i32
    return %arg0, %c0_i32 : i32, i32
  }
  func.func @transform_1(%arg0: i32) -> (i32, i32) {
    %c0_i32 = arith.constant 0 : i32
    %c0_i32_0 = arith.constant 0 : i32
    %c0_i32_1 = arith.constant 0 : i32
    return %c0_i32, %c0_i32_0 : i32, i32
  }
  func.func @transform_2(%arg0: i32) -> (i32, i32) {
    %c0_i32 = arith.constant 0 : i32
    %c0_i32_0 = arith.constant 0 : i32
    return %arg0, %c0_i32 : i32, i32
  }
  func.func @transform_3(%arg0: i32) -> (i32, i32) {
    %c0_i32 = arith.constant 0 : i32
    %c0_i32_0 = arith.constant 0 : i32
    return %arg0, %c0_i32 : i32, i32
  }
  func.func @transform_4(%arg0: i32) -> (i32, i32) {
    %c0_i32 = arith.constant 0 : i32
    %c0_i32_0 = arith.constant 0 : i32
    %c0_i32_1 = arith.constant 0 : i32
    return %c0_i32, %c0_i32_0 : i32, i32
  }
  func.func @transform_5(%arg0: i32) -> (i32, i32) {
    %c0_i32 = arith.constant 0 : i32
    %c0_i32_0 = arith.constant 0 : i32
    %c0_i32_1 = arith.constant 0 : i32
    return %c0_i32, %c0_i32_0 : i32, i32
  }
  func.func @transform_6(%arg0: i32) -> (i32, i32) {
    %c0_i32 = arith.constant 0 : i32
    %c0_i32_0 = arith.constant 0 : i32
    %c0_i32_1 = arith.constant 0 : i32
    return %c0_i32, %c0_i32_0 : i32, i32
  }
  func.func @transform_7(%arg0: i32) -> (i32, i32) {
    %c0_i32 = arith.constant 0 : i32
    %c0_i32_0 = arith.constant 0 : i32
    %c0_i32_1 = arith.constant 0 : i32
    return %c0_i32, %c0_i32_0 : i32, i32
  }
  func.func @transform_8(%arg0: i32) -> (i32, i32) {
    %c0_i32 = arith.constant 0 : i32
    %c0_i32_0 = arith.constant 0 : i32
    return %arg0, %c0_i32 : i32, i32
  }
}

</mosaic_0001>

<bundles_post_ra>
// kernel: tpu_custom_call.1
= control target key start
LH: loop header
LB: loop body
LE: loop exit
PB: predicated region body
PF: predicated region fallthrough
CT: control target
= control target key end

     0   :  { %13 = vsyncpa [#allocation3], 0  ;;  %s2957_s0 = inlined_call_operand.vmem [shape: s8[64,64], index: 0, kind: input, shape index: {}]   ;;  %s2958_s1 = inlined_call_operand.vmem [shape: bf16[64,8], index: 1, kind: input, shape index: {}]   ;;  %s2959_s2 = inlined_call_operand.vmem [shape: f32[64,1], index: 2, kind: input, shape index: {}]   ;;  %s2960_s3 = inlined_call_operand.vmem [shape: f32[64,8], index: 3, kind: input, shape index: {}]   ;;  %s2961_s4 = inlined_call_operand.vmem [shape: f32[4,8], index: 4, kind: input, shape index: {}]   ;;  %s2962_s5 = inlined_call_operand.vmem [shape: f32[1,4], index: 5, kind: input, shape index: {}]   ;;  %s2963_s6 = inlined_call_operand.vmem [shape: bf16[32,128], index: 6, kind: input, shape index: {}]   ;;  %s2964_s7 = inlined_call_operand.vmem [shape: f32[4,128], index: 7, kind: input, shape index: {}]   ;;  %s2965_s8 = inlined_call_operand.hbm [shape: f32[64,128], index: 8, kind: output, shape index: {}]  }
   0x1   :  { %15 = vsyncpa [#allocation3 + $0x1], 0  ;;  %s2542_s27 = smov 0   ;;  %s2544_s28 = smov 0  }
   0x2   :  { %s2546_s29 = smov 0   ;;  %s2548_s30 = smov 0  }
   0x3 LB: > { %s2563_s9 = sadd.s32 4294967295, %s2488_s30   ;;  %s2096_s10 = sadd.s32 4294967294, %s2488_s30   ;;  %s2488_s30 = sphi %s2548_s30, %s2987_s30   ;;  %s2484_s29 = sphi %s2546_s29, %s2986_s29   ;;  %s2480_s28 = sphi %s2544_s28, %s2985_s28   ;;  %s2476_s27 = sphi %s2542_s27, %s2984_s27  }
   0x4   : > { %s2567_s11 = sadd.s32 1, %s2488_s30   ;;  %s211_s12 = sadd.s32 1, %s2484_s29 }
   0x5   : > { %s208_s13 = ssub.s32 %s2488_s30, %s2567_s11  ;;  %p221_p0 = scmp.ne.s32.totalorder %s2484_s29, %s2480_s28 }
   0x6   : > { %p209_p1 = scmp.eq.s32.totalorder %s208_s13, 0  ;;  %p222_p2 = scmp.eq.s32.totalorder %s2563_s9, 1 }
   0x7   : > { %p227_p3 = scmp.ne.s32.totalorder %s2480_s28, %s2476_s27  ;;  %p228_p4 = scmp.eq.s32.totalorder %s2096_s10, 1 }
   0x8   : > { %s2578_s14 = scalar_select %p209_p1, %s2484_s29, %s211_s12  }
   0x9   : > { %p2580_p5 = por %p222_p2, %p221_p0  ;;  %p2584_p6 = por %p228_p4, %p227_p3 }
   0xa   : > { %p2099_p7 = scmp.ge.s32.totalorder %s2488_s30, 1  ;;  %p286_p8 = scmp.lt.s32.totalorder %s2488_s30, 3 }
   0xc   : > { %p287_p9 = pnand %p2099_p7, %p286_p8 }
   0xd   : > { %v472_v0 = vld [vmem:[%s2961_s4] sm:$0xf] (!%p287_p9)  ;;  %vm473_vm0 = vcmask (!%p287_p9), 64512   ;;  %s2102_s19 = sshll.u32 (!%p287_p9), %s2563_s9, 2  ;;  %vm1079_vm1 = vcmask (!%p287_p9), 31744   ;;  %v2421_v53 = vld [vmem:[%s2958_s1 + $0x8] sm:$0xff] (!%p287_p9)   ;;  %v1092_v59 = vlaneseq (!%p287_p9) }
   0xe   : > { %290 = sbr.rel (%p287_p9) target bundleno = 1112 (0x458), region = 52  ;;  %v487_v1 = vsel (!%p287_p9), %vm473_vm0, %v472_v0, 0  ;;  %p334_p10 = scmp.lt.s32.totalorder (!%p287_p9), %s2102_s19, 7  ;;  %v2112_v37 = vld [vmem:[%s2962_s5] ss:$0 sm:$0xff] (!%p287_p9)  ;;  %v2422_v54 = vld [vmem:[%s2958_s1 + $0x10] sm:$0xff] (!%p287_p9)  }
   0xf   : > { %v2595_v2 = vand.u32 (!%p287_p9), 4294901760, %v487_v1  ;;  %v2420_v52 = vld [vmem:[%s2958_s1] sm:$0xff] (!%p287_p9)   ;;  %p329_p11 = scmp.lt.s32.totalorder (!%p287_p9), %s2563_s9, 1  ;;  %vm384_vm2 = vcmask (!%p287_p9), 523264   ;;  %v2423_v57 = vld [vmem:[%s2958_s1 + $0x18] sm:$0xff] (!%p287_p9)   ;;  %v2640_v60 = vand.u32 (!%p287_p9), 127, %v1092_v59 }
  0x10   : > { %2217 = vmatprep.subr.bf16.mxu0 (!%p287_p9), %v2420_v52  ;;  %vm1347_vm11 = vcmask (!%p287_p9), 1043456   ;;  %s2494_s26 = smov (!%p287_p9), 24   ;;  %s326_s10 = sand.u32 (!%p287_p9), 1, %s2480_s28  }
  0x11   : > { %2229 = vmatprep.subr.mxu1 (!%p287_p9), %v2595_v2  ;;  %v597_v3 = vsub.f32 (!%p287_p9), %v487_v1, %v2595_v2  ;;  %2218 = vmatpush3.bf16.msra.mxu0 (!%p287_p9), %v2420_v52  ;;  %s2100_s12 = sshll.u32 (!%p287_p9), %s326_s10, 5  ;;  %s2146_s18 = sshll.u32 (!%p287_p9), %s2563_s9, 9 }
  0x12   : > { %2230 = vmatpush3.xpose.msra.mxu1 (!%p287_p9), %v2595_v2  ;;  %2219 = vmatprep.subr.bf16.mxu0 (!%p287_p9), %v2421_v53  ;;  %s328_s13 = scalar_lea.vmem (!%p287_p9), [#allocation2], %s2100_s12  ;;  %s2495_s24 = smov (!%p287_p9), [#allocation2]  }
  0x13   : > { %v598_v4 = vand.u32 (!%p287_p9), 4294901760, %v597_v3 }
  0x15   : > { %s2989_s19 = smov (!%p334_p10, %s2102_s19), 7  ;;  %v599_v9 = vsub.f32 %v597_v3, %v598_v4  ;;  %2220 = vmatpush3.bf16.msra.mxu0 %v2421_v53 }
  0x16   : > { %s2103_s20 = sshll.u32 %s2989_s19, 3  ;;  %2221 = vmatprep.subr.bf16.mxu0 %v2422_v54 }
  0x17   : > { %s343_s23 = scalar_lea.vmem %s2960_s3, %s2103_s20  ;;  %v600_v17 = vand.u32 4294901760, %v599_v9  ;;  %s337_s21 = scalar_lea.vmem %s2959_s2, %s2103_s20 }
  0x18   : > { %v468_v5 = vld [vmem:[%s343_s23] sm:$0xff]  ;;  %v469_v6 = vld [vmem:[%s343_s23 + $0x8] sm:$0xff]  ;;  %v470_v7 = vld [vmem:[%s343_s23 + $0x10] sm:$0xff]  ;;  %s330_s17 = scalar_select %p329_p11, %s2563_s9, 1 }
  0x19   : > { %v475_v8 = vsel %vm473_vm0, %v468_v5, 0  ;;  %v478_v10 = vsel %vm473_vm0, %v469_v6, 0  ;;  %v481_v11 = vsel %vm473_vm0, %v470_v7, 0  ;;  %v471_v12 = vld [vmem:[%s343_s23 + $0x18] sm:$0xff]  ;;  %2237 = vmatprep.subr.mxu1 %v600_v17  ;;  %2222 = vmatpush3.bf16.msra.mxu0 %v2422_v54  ;;  %s2913_s20 = scalar_lea.hbm %s2965_s8, %s2146_s18  ;;  %s2915_s9 = scalar_lea.sflag [#allocation3], %s326_s10 }
  0x1a   : > { %v555_v13 = vand.u32 4294901760, %v475_v8  ;;  %v565_v14 = vand.u32 4294901760, %v478_v10  ;;  %v575_v15 = vand.u32 4294901760, %v481_v11  ;;  %v484_v16 = vsel %vm473_vm0, %v471_v12, 0  ;;  %s2101_s22 = sshll.u32 %s330_s17, 3  ;;  %2223 = vmatprep.subr.bf16.mxu0 %v2423_v57  ;;  %s2010_s17 = sshll.u32 %s328_s13, 4  ;;  %s2908_s17 = int_to_ptr.vmem [resolvable:$true] %s2010_s17 }
  0x1b   : > { %v585_v18 = vand.u32 4294901760, %v484_v16  ;;  %s332_s25 = scalar_lea.vmem %s2957_s0, %s2101_s22  ;;  %s2492_s22 = smov 8  }
  0x1c   : > { %v556_v19 = vsub.f32 %v475_v8, %v555_v13  ;;  %v566_v20 = vsub.f32 %v478_v10, %v565_v14  ;;  %v576_v21 = vsub.f32 %v481_v11, %v575_v15  ;;  %v349_v55 = vld [vmem:[%s332_s25] sm:$0xff]  ;;  %s2493_s25 = smov 16   ;;  %s2426_s23 = scalar_lea.vmem %s2908_s17, 512 }
  0x1d   : > { %v586_v22 = vsub.f32 %v484_v16, %v585_v18  ;;  %v350_v56 = vunpack.c.l.s8.bf16 %v349_v55  ;;  %v351_v58 = vunpack.c.h.s8.bf16 %v349_v55  ;;  %2224 = vmatpush3.bf16.msra.mxu0 %v2423_v57  ;;  %p2427_p12 = scmp.ne.s32.totalorder %s2908_s17, %s2426_s23 }
  0x1e   : > { %v557_v23 = vand.u32 4294901760, %v556_v19  ;;  %v567_v24 = vand.u32 4294901760, %v566_v20  ;;  %v577_v25 = vand.u32 4294901760, %v576_v21 }
  0x1f   : > { %v587_v26 = vand.u32 4294901760, %v586_v22  ;;  %2225 = vmatprep.mubr.msk.bf16.mxu0 %vm384_vm2, %v350_v56  ;;  %p2428_p13 = pnand %p2427_p12, %p2580_p5 }
  0x20   : > { %v558_v27 = vsub.f32 %v556_v19, %v557_v23  ;;  %v568_v28 = vsub.f32 %v566_v20, %v567_v24  ;;  %v578_v29 = vsub.f32 %v576_v21, %v577_v25  ;;  %2226 = vmatmul.mubr.msk.bf16.vlgmr.msra.gmra.mrb[0].mxu0 %vm384_vm2, %v351_v58 }
  0x21   : > { %v588_v30 = vsub.f32 %v586_v22, %v587_v26  ;;  %p2429_p0 = pneg %p2428_p13 }
  0x22   : > { %v559_v31 = vand.u32 4294901760, %v558_v27  ;;  %v569_v32 = vand.u32 4294901760, %v568_v28  ;;  %v579_v33 = vand.u32 4294901760, %v578_v29 }
  0x23   : > { %v589_v34 = vand.u32 4294901760, %v588_v30 }
  0x24   : > { %2231 = vmatprep.mubr.f32.mxu1 %v559_v31 }
  0x25   : > { %2232 = vmatmul.mubr.f32.vlgmr.msra.gmra.mrb[0].mxu1 %v569_v32 }
  0x26   : > { %2238 = vmatpush3.xpose.msra.mxu1 %v600_v17  ;;  %2234 = vmatprep.mubr.f32.mxu1 %v579_v33  ;;  %v2490_v17 = vmov 0  }
  0x27   : > { %2245 = vmatprep.subr.mxu1 %v597_v3  ;;  %2419 = vset.pattern.permute.xlu1 %v2490_v17 }
  0x28   : > { %2418 = vset.pattern.permute.xlu0 %v2490_v17 }
  0x29   : > { %2235 = vmatmul.mubr.f32.gmra.mrb[2].mxu1 %v589_v34  ;;  %v1334_v34 = vld [vmem:[%s2964_s7] sm:$0xf] }
  0x2a   : > { %2239 = vmatprep.mubr.f32.mxu1 %v555_v13 }
  0x2d   : > { %2240 = vmatmul.mubr.f32.vlgmr.msra.gmra.mrb[0].mxu1 %v565_v14 }
  0x2e   : > { %2246 = vmatpush3.xpose.msra.mxu1 %v597_v3  ;;  %2242 = vmatprep.mubr.f32.mxu1 %v575_v15 }
  0x2f   : > { %2253 = vmatprep.subr.mxu1 %v2595_v2 }
  0x31   : > { %2243 = vmatmul.mubr.f32.gmra.mrb[2].mxu1 %v585_v18 }
  0x32   : > { %2247 = vmatprep.mubr.f32.mxu1 %v556_v19 }
  0x35   : > { %2248 = vmatmul.mubr.f32.vlgmr.msra.gmra.mrb[0].mxu1 %v566_v20 }
  0x36   : > { %2254 = vmatpush3.xpose.msra.mxu1 %v2595_v2  ;;  %2250 = vmatprep.mubr.f32.mxu1 %v576_v21 }
  0x37   : > { %2261 = vmatprep.subr.mxu1 %v598_v4 }
  0x39   : > { %2251 = vmatmul.mubr.f32.gmra.mrb[2].mxu1 %v586_v22 }
  0x3a   : > { %2255 = vmatprep.mubr.f32.mxu1 %v557_v23 }
  0x3d   : > { %2256 = vmatmul.mubr.f32.vlgmr.msra.gmra.mrb[0].mxu1 %v567_v24 }
  0x3e   : > { %2262 = vmatpush3.xpose.msra.mxu1 %v598_v4  ;;  %2258 = vmatprep.mubr.f32.mxu1 %v577_v25 }
  0x3f   : > { %2269 = vmatprep.subr.mxu1 %v2595_v2 }
  0x41   : > { %2259 = vmatmul.mubr.f32.gmra.mrb[2].mxu1 %v587_v26 }
  0x42   : > { %2263 = vmatprep.mubr.f32.mxu1 %v555_v13 }
  0x45   : > { %2264 = vmatmul.mubr.f32.vlgmr.msra.gmra.mrb[0].mxu1 %v565_v14 }
  0x46   : > { %2270 = vmatpush3.xpose.msra.mxu1 %v2595_v2  ;;  %2266 = vmatprep.mubr.f32.mxu1 %v575_v15 }
  0x49   : > { %2267 = vmatmul.mubr.f32.gmra.mrb[2].mxu1 %v585_v18 }
  0x4a   : > { %2271 = vmatprep.mubr.f32.mxu1 %v555_v13 }
  0x4d   : > { %2272 = vmatmul.mubr.f32.vlgmr.msra.gmra.mrb[0].mxu1 %v565_v14 }
  0x4e   : > { %2274 = vmatprep.mubr.f32.mxu1 %v575_v15 }
  0x51   : > { %2275 = vmatmul.mubr.f32.gmra.mrb[2].mxu1 %v585_v18 }
 0x120   : > { %v2273_v35 = vpop.f32.mrb[0].mxu1 }
 0x121   : > { %v1042_v36 = vpop.f32.mrb[1].mxu1  ;;  %v1066_v38 = vmul.f32 2.0, %v2273_v35  ;;  %v1349_v35 = vsel %vm1347_vm11, %v1334_v34, 0 }
 0x122   : > { %v1065_v39 = vmul.f32 2.0, %v1042_v36  ;;  %v2655_v36 = vand.u32 4294901760, %v1349_v35 }
 0x123   : > { %v1076_v46 = vsub.f32 %v2112_v37, %v1066_v38 }
 0x124   : > { %v2276_v40 = vpop.f32.mrb[2].mxu1  ;;  %v1075_v41 = vsub.f32 %v2112_v37, %v1065_v39  ;;  %2277 = vmatprep.subr.mxu1 %v2655_v36 }
 0x125   : > { %v1054_v42 = vpop.f32.mrb[3].mxu1  ;;  %v1068_v43 = vmul.f32 2.0, %v2276_v40  ;;  %v1083_v48 = vsel %vm1079_vm1, %v1076_v46, inf  ;;  %2278 = vmatpush3.msra.mxu1 %v2655_v36  ;;  %v2672_v40 = vpop.f32.mrb[0].mxu0 }
 0x126   : > { %v1067_v44 = vmul.f32 2.0, %v1054_v42  ;;  %v1080_v45 = vsel %vm1079_vm1, %v1075_v41, inf }
 0x127   : > { %1081 = vmin.xlane.f32.xlu0 %v1080_v45  ;;  %v1078_v50 = vsub.f32 %v2112_v37, %v1068_v43  ;;  %v441_v43 = vld [vmem:[%s337_s21 + $0x8] sm:$0xff]  ;;  %v440_v45 = vld [vmem:[%s337_s21] sm:$0xff] }
 0x128   : > { %v1077_v47 = vsub.f32 %v2112_v37, %v1067_v44  ;;  %v2658_v37 = vsub.f32 %v1349_v35, %v2655_v36 }
 0x129   : > { %v1089_v51 = vsel %vm1079_vm1, %v1078_v50, inf }
 0x12a   : > { %v1086_v49 = vsel %vm1079_vm1, %v1077_v47, inf  ;;  %v2663_v38 = vand.u32 4294901760, %v2658_v37 }
 0x12b   : > { %1084 = vmin.xlane.f32.xlu0 %v1083_v48  ;;  %1087 = vmin.xlane.f32.xlu1 %v1086_v49  ;;  %v443_v48 = vld [vmem:[%s337_s21 + $0x18] sm:$0xff] }
 0x12c   : > { %v1461_v39 = vsub.f32 %v2658_v37, %v2663_v38 }
 0x12e   : > { %v1462_v42 = vand.u32 4294901760, %v1461_v39 }
 0x12f   : > { %1090 = vmin.xlane.f32.xlu1 %v1089_v51 }
 0x130   : > { %2285 = vmatprep.subr.mxu0 %v1462_v42 }
 0x131   : > { %2286 = vmatpush3.msra.mxu0 %v1462_v42 }
 0x132   : > { %2293 = vmatprep.subr.mxu0 %v2658_v37 }
 0x1b4   : > { %v1082_v61 = vpop.xlane.xlu0 %1081 }
 0x1b5   : > { %vm1094_vm3 = vcmp.eq.f32.partialorder %v1075_v41, %v1082_v61  ;;  %v2674_v41 = vpop.f32.mrb[1].mxu0 }
 0x1b6   : > { %v1098_v62 = vsel %vm1094_vm3, %v2640_v60, 4  ;;  %v2676_v44 = vpop.f32.mrb[2].mxu0 }
 0x1b7   : > { %v1102_v63 = vsel %vm1079_vm1, %v1098_v62, 2147483647 }
 0x1b8   : > { %v1085_v0 = vpop.xlane.xlu0 %1084  ;;  %v1088_v1 = vpop.xlane.xlu1 %1087  ;;  %v1104_v2 = vshra.s32 %v1102_v63, 16  ;;  %v1103_v18 = vand.u32 65535, %v1102_v63 }
 0x1b9   : > { %vm1095_vm4 = vcmp.eq.f32.partialorder %v1076_v46, %v1085_v0  ;;  %vm1096_vm5 = vcmp.eq.f32.partialorder %v1077_v47, %v1088_v1  ;;  %v2678_v46 = vpop.f32.mrb[3].mxu0  ;;  %v442_v47 = vld [vmem:[%s337_s21 + $0x10] sm:$0xff]  ;;  %v2491_v1 = vmov 0.0  }
 0x1ba   : > { %v1099_v3 = vsel %vm1095_vm4, %v2640_v60, 4  ;;  %v1100_v4 = vsel %vm1096_vm5, %v2640_v60, 4  ;;  %v1106_v5 = vcvt.s32.f32 %v1104_v2  ;;  %v1105_v20 = vcvt.s32.f32 %v1103_v18 }
 0x1bb   : > { %v1117_v6 = vsel %vm1079_vm1, %v1099_v3, 2147483647  ;;  %v1132_v7 = vsel %vm1079_vm1, %v1100_v4, 2147483647 }
 0x1bc   : > { %1107 = vmin.xlane.f32.xlu0 %v1106_v5  ;;  %v1091_v8 = vpop.xlane.xlu1 %1090  ;;  %v1119_v9 = vshra.s32 %v1117_v6, 16  ;;  %v1134_v10 = vshra.s32 %v1132_v7, 16  ;;  %v1133_v21 = vand.u32 65535, %v1132_v7  ;;  %v1118_v22 = vand.u32 65535, %v1117_v6 }
 0x1bd   : > { %vm1097_vm6 = vcmp.eq.f32.partialorder %v1078_v50, %v1091_v8 }
 0x1be   : > { %v1101_v11 = vsel %vm1097_vm6, %v2640_v60, 4  ;;  %v1121_v12 = vcvt.s32.f32 %v1119_v9  ;;  %v1136_v13 = vcvt.s32.f32 %v1134_v10  ;;  %v1135_v26 = vcvt.s32.f32 %v1133_v21 }
 0x1bf   : > { %v1147_v14 = vsel %vm1079_vm1, %v1101_v11, 2147483647  ;;  %v1120_v27 = vcvt.s32.f32 %v1118_v22 }
 0x1c0   : > { %1122 = vmin.xlane.f32.xlu1 %v1121_v12  ;;  %1137 = vmin.xlane.f32.xlu0 %v1136_v13  ;;  %v1149_v15 = vshra.s32 %v1147_v14, 16  ;;  %v1148_v28 = vand.u32 65535, %v1147_v14 }
 0x1c2   : > { %v1151_v16 = vcvt.s32.f32 %v1149_v15  ;;  %v1150_v32 = vcvt.s32.f32 %v1148_v28 }
 0x1c4   : > { %1152 = vmin.xlane.f32.xlu1 %v1151_v16 }
 0x249   : > { %v1108_v19 = vpop.xlane.xlu0 %1107 }
 0x24a   : > { %vm1109_vm7 = vcmp.eq.f32.partialorder %v1106_v5, %v1108_v19  ;;  %v1114_v49 = vcvt.f32.s32 %v1108_v19 }
 0x24b   : > { %v1110_v23 = vsel %vm1109_vm7, %v1105_v20, inf }
 0x24c   : > { %1111 = vmin.xlane.f32.xlu0 %v1110_v23  ;;  %v1115_v53 = vshll.u32 %v1114_v49, 16 }
 0x24d   : > { %v1138_v24 = vpop.xlane.xlu0 %1137  ;;  %v1123_v25 = vpop.xlane.xlu1 %1122 }
 0x24e   : > { %vm1139_vm8 = vcmp.eq.f32.partialorder %v1136_v13, %v1138_v24  ;;  %vm1124_vm9 = vcmp.eq.f32.partialorder %v1121_v12, %v1123_v25  ;;  %v1144_v50 = vcvt.f32.s32 %v1138_v24  ;;  %v1129_v51 = vcvt.f32.s32 %v1123_v25 }
 0x24f   : > { %v1140_v29 = vsel %vm1139_vm8, %v1135_v26, inf  ;;  %v1125_v30 = vsel %vm1124_vm9, %v1120_v27, inf }
 0x250   : > { %1141 = vmin.xlane.f32.xlu0 %v1140_v29  ;;  %1126 = vmin.xlane.f32.xlu1 %v1125_v30  ;;  %v1145_v57 = vshll.u32 %v1144_v50, 16  ;;  %v1130_v58 = vshll.u32 %v1129_v51, 16 }
 0x251   : > { %v1153_v31 = vpop.xlane.xlu1 %1152 }
 0x252   : > { %vm1154_vm10 = vcmp.eq.f32.partialorder %v1151_v16, %v1153_v31  ;;  %v1159_v55 = vcvt.f32.s32 %v1153_v31 }
 0x253   : > { %v1155_v33 = vsel %vm1154_vm10, %v1150_v32, inf  ;;  %v2424_v32 = vld [vmem:[%s2963_s6] sm:$0xff]  }
 0x254   : > { %1156 = vmin.xlane.f32.xlu1 %v1155_v33  ;;  %v1160_v0 = vshll.u32 %v1159_v55, 16  ;;  %2325 = vmatprep.subr.bf16.mxu1 %v2424_v32 }
 0x265   : > { %451 = vperm.xlu1 %2419, %v441_v43  }
 0x266   : > { %446 = vperm.xlu0 %2418, %v440_v45  }
 0x269   : > { %456 = vperm.xlu1 %2419, %v442_v47  }
 0x26d   : > { %461 = vperm.xlu1 %2419, %v443_v48  }
 0x2d9   : > { %v1112_v52 = vpop.xlane.xlu0 %1111 }
 0x2da   : > { %v1113_v54 = vcvt.f32.s32 %v1112_v52 }
 0x2dc   : > { %v2681_v56 = vadd.s32 %v1115_v53, %v1113_v54 }
 0x2dd   : > { %v1142_v59 = vpop.xlane.xlu0 %1141  ;;  %v1127_v61 = vpop.xlane.xlu1 %1126 }
 0x2de   : > { %v1143_v62 = vcvt.f32.s32 %v1142_v59  ;;  %v1128_v63 = vcvt.f32.s32 %v1127_v61  ;;  %vm1322_vm12 = vcmp.eq.s32.totalorder %v2640_v60, %v2681_v56  ;;  %vm1194_vm13 = vcmp.eq.s32.totalorder %v2681_v56, 1  ;;  %v2425_v59 = vld [vmem:[%s2963_s6 + $0x8] sm:$0xff]  }
 0x2df   : > { %v2686_v2 = vsel %vm1322_vm12, 1.0, %v2491_v1  ;;  %vm1206_vm14 = vmpackc.low %vm1194_vm13, %vm1194_vm13  ;;  %vm1224_vm15 = vcmp.eq.s32.totalorder %v2681_v56, 2  ;;  %vm1254_vm3 = vcmp.eq.s32.totalorder %v2681_v56, 3  ;;  %vm1164_vm4 = vcmp.eq.s32.totalorder %v2681_v56, 0 }
 0x2e0   : > { %v2689_v3 = vadd.s32 %v1145_v57, %v1143_v62  ;;  %v2691_v4 = vadd.s32 %v1130_v58, %v1128_v63  ;;  %v1336_v5 = vsel %vm1079_vm1, %v2686_v2, 0  ;;  %2287 = vmatprep.mubr.msk.f32.mxu0 %vm1079_vm1, %v2686_v2  ;;  %vm1236_vm2 = vmpackc.low %vm1224_vm15, %vm1224_vm15  ;;  %v1210_v8 = vsel %vm1206_vm14, 65537, %v2490_v17 }
 0x2e1   : > { %v2698_v6 = vsub.f32 %v1336_v5, %v1336_v5  ;;  %v1157_v7 = vpop.xlane.xlu1 %1156  ;;  %v1240_v9 = vsel %vm1236_vm2, 65537, %v2490_v17  ;;  %vm2767_vm15 = vmpackc.low %vm1254_vm3, %vm1254_vm3 }
 0x2e2   : > { %v1158_v10 = vcvt.f32.s32 %v1157_v7  ;;  %vm1323_vm5 = vcmp.eq.s32.totalorder %v2640_v60, %v2691_v4  ;;  %vm1324_vm6 = vcmp.eq.s32.totalorder %v2640_v60, %v2689_v3  ;;  %vm1195_vm7 = vcmp.eq.s32.totalorder %v2691_v4, 1 }
 0x2e3   : > { %v2708_v11 = vsel %vm1323_vm5, 1.0, %v2491_v1  ;;  %v2710_v12 = vsel %vm1324_vm6, 1.0, %v2491_v1  ;;  %v1419_v13 = vand.u32 4294901760, %v2698_v6  ;;  %vm1207_vm8 = vmpackc.low %vm1195_vm7, %vm1195_vm7  ;;  %vm1225_vm9 = vcmp.eq.s32.totalorder %v2691_v4, 2 }
 0x2e4   : > { %v2714_v14 = vadd.s32 %v1160_v0, %v1158_v10  ;;  %v1339_v15 = vsel %vm1079_vm1, %v2708_v11, 0  ;;  %2288 = vmatmul.mubr.msk.f32.vlgmr.msra.gmra.mrb[4].mxu0 %vm1079_vm1, %v2708_v11  ;;  %v1211_v16 = vsel %vm1207_vm8, 65537, %v2490_v17  ;;  %v1342_v18 = vsel %vm1079_vm1, %v2710_v12, 0  ;;  %vm1237_vm10 = vmpackc.low %vm1225_vm9, %vm1225_vm9 }
 0x2e5   : > { %v2723_v19 = vsub.f32 %v1339_v15, %v1339_v15  ;;  %v452_v20 = vpop.permute.xlu1 %451  ;;  %v447_v21 = vpop.permute.xlu0 %446  ;;  %2290 = vmatprep.mubr.msk.f32.mxu0 %vm1079_vm1, %v2710_v12  ;;  %v1420_v22 = vsub.f32 %v2698_v6, %v1419_v13  ;;  %2294 = vmatpush3.msra.mxu0 %v2658_v37  ;;  %v2115_v23 = vcombine.low %v1210_v8, %v1211_v16  ;;  %v1241_v24 = vsel %vm1237_vm10, 65537, %v2490_v17  ;;  %vm2794_vm8 = vmpackc.low %vm1164_vm4, %vm1164_vm4 }
 0x2e6   : > { %v465_v25 = vmul.f32 %v452_v20, %v2678_v46  ;;  %v464_v26 = vmul.f32 %v447_v21, %v2674_v41  ;;  %vm1325_vm11 = vcmp.eq.s32.totalorder %v2640_v60, %v2714_v14  ;;  %v2736_v27 = vsub.f32 %v1342_v18, %v1342_v18  ;;  %2301 = vmatprep.subr.mxu0 %v2655_v36 }
 0x2e7   : > { %v2739_v28 = vsel %vm1325_vm11, 1.0, %v2491_v1  ;;  %v1421_v29 = vand.u32 4294901760, %v1420_v22  ;;  %vm2741_vm12 = vcmp.ne.s16.totalorder %v2115_v23, 0  ;;  %v1429_v31 = vand.u32 4294901760, %v2723_v19 }
 0x2e8   : > { %v2749_v33 = vpack.c.bf16 %v465_v25, %v464_v26  ;;  %2291 = vmatmul.mubr.msk.f32.gmra.mrb[6].mxu0 %vm1079_vm1, %v2739_v28  ;;  %v1439_v60 = vand.u32 4294901760, %v2736_v27  ;;  %v2117_v34 = vcombine.low %v1240_v9, %v1241_v24  ;;  %v1345_v35 = vsel %vm1079_vm1, %v2739_v28, 0 }
 0x2e9   : > { %2279 = vmatprep.mubr.f32.mxu1 %v1421_v29  ;;  %v457_v37 = vpop.permute.xlu1 %456  ;;  %2295 = vmatprep.mubr.f32.mxu0 %v2698_v6  ;;  %v1430_v39 = vsub.f32 %v2723_v19, %v1429_v31  ;;  %v2760_v41 = vsub.f32 %v1345_v35, %v1345_v35  ;;  %vm1256_vm13 = vcmp.eq.s32.totalorder %v2689_v3, 3  ;;  %vm1257_vm14 = vcmp.eq.s32.totalorder %v2714_v14, 3 }
 0x2ea   : > { %v1222_v43 = vsel %vm2741_vm12, %v2749_v33, 0  ;;  %v1440_v45 = vsub.f32 %v2736_v27, %v1439_v60  ;;  %vm2777_vm2 = vcmp.ne.s16.totalorder %v2117_v34, 0  ;;  %vm1268_vm5 = vmpackc.low %vm1256_vm13, %vm1256_vm13  ;;  %vm1196_vm6 = vcmp.eq.s32.totalorder %v2689_v3, 1 }
 0x2eb   : > { %1286 = vrot.lane.b32.xlu1 %v1222_v43, %s2492_s22  ;;  %v1431_v47 = vand.u32 4294901760, %v1430_v39  ;;  %v1252_v48 = vsel %vm2777_vm2, %v2749_v33, 0  ;;  %v1449_v49 = vand.u32 4294901760, %v2760_v41  ;;  %vm1269_vm3 = vmpackc.low %vm1257_vm14, %vm1257_vm14  ;;  %v1272_v50 = vsel %vm1268_vm5, 65537, %v2490_v17 }
 0x2ec   : > { %2296 = vmatmul.mubr.f32.vlgmr.msra.gmra.mrb[4].mxu0 %v2723_v19  ;;  %v1441_v51 = vand.u32 4294901760, %v1440_v45  ;;  %v1273_v52 = vsel %vm1269_vm3, 65537, %v2490_v17  ;;  %vm1197_vm7 = vcmp.eq.s32.totalorder %v2714_v14, 1  ;;  %vm1208_vm9 = vmpackc.low %vm1196_vm6, %vm1196_vm6  ;;  %vm1226_vm10 = vcmp.eq.s32.totalorder %v2689_v3, 2 }
 0x2ed   : > { %2280 = vmatmul.mubr.f32.vlgmr.msra.gmra.mrb[4].mxu1 %v1431_v47  ;;  %v462_v54 = vpop.permute.xlu1 %461  ;;  %2298 = vmatprep.mubr.f32.mxu0 %v2736_v27  ;;  %v1450_v55 = vsub.f32 %v2760_v41, %v1449_v49  ;;  %v2120_v57 = vcombine.low %v1272_v50, %v1273_v52  ;;  %vm1227_vm11 = vcmp.eq.s32.totalorder %v2714_v14, 2  ;;  %v466_v56 = vmul.f32 %v2672_v40, %v457_v37  ;;  %vm1209_vm4 = vmpackc.low %vm1197_vm7, %vm1197_vm7 }
 0x2ee   : > { %v467_v58 = vmul.f32 %v2676_v44, %v462_v54  ;;  %2282 = vmatprep.mubr.f32.mxu1 %v1441_v51  ;;  %2302 = vmatpush3.msra.mxu0 %v2655_v36  ;;  %vm1255_vm12 = vcmp.eq.s32.totalorder %v2691_v4, 3  ;;  %v1212_v62 = vsel %vm1208_vm9, 65537, %v2490_v17  ;;  %v1213_v40 = vsel %vm1209_vm4, 65537, %v2490_v17  ;;  %vm1238_vm13 = vmpackc.low %vm1226_vm10, %vm1226_vm10 }
 0x2ef   : > { %1292 = vrot.lane.b32.xlu1 %v1252_v48, %s2493_s25  ;;  %v1451_v61 = vand.u32 4294901760, %v1450_v55  ;;  %2309 = vmatprep.subr.mxu0 %v2663_v38  ;;  %vm1165_vm14 = vcmp.eq.s32.totalorder %v2691_v4, 0  ;;  %vm2819_vm2 = vcmp.ne.s16.totalorder %v2120_v57, 0  ;;  %v2116_v0 = vcombine.low %v1212_v62, %v1213_v40  ;;  %vm1239_vm5 = vmpackc.low %vm1227_vm11, %vm1227_vm11 }
 0x2f0   : > { %v2816_v44 = vpack.c.bf16 %v467_v58, %v466_v56  ;;  %2299 = vmatmul.mubr.f32.gmra.mrb[6].mxu0 %v2760_v41  ;;  %v1270_v1 = vsel %vm2767_vm15, 65537, %v2490_v17  ;;  %2326 = vmatpush3.bf16.msra.mxu1 %v2424_v32  ;;  %v1242_v5 = vsel %vm1238_vm13, 65537, %v2490_v17  ;;  %v1243_v7 = vsel %vm1239_vm5, 65537, %v2490_v17  ;;  %vm1267_vm3 = vmpackc.low %vm1255_vm12, %vm1255_vm12 }
 0x2f1   : > { %2283 = vmatmul.mubr.f32.gmra.mrb[6].mxu1 %v1451_v61  ;;  %2303 = vmatprep.mubr.f32.mxu0 %v1419_v13  ;;  %vm1166_vm6 = vcmp.eq.s32.totalorder %v2689_v3, 0  ;;  %vm1167_vm7 = vcmp.eq.s32.totalorder %v2714_v14, 0  ;;  %vm1221_vm15 = vcmp.ne.s16.totalorder %v2116_v0, 0  ;;  %v2118_v9 = vcombine.low %v1242_v5, %v1243_v7  ;;  %vm1177_vm9 = vmpackc.low %vm1165_vm14, %vm1165_vm14 }
 0x2f2   : > { %v1283_v8 = vsel %vm2819_vm2, %v2816_v44, 0  ;;  %v1271_v6 = vsel %vm1267_vm3, 65537, %v2490_v17  ;;  %2327 = vmatprep.subr.bf16.mxu1 %v2425_v59  ;;  %v1223_v10 = vsel %vm1221_vm15, %v2816_v44, 0  ;;  %v1180_v13 = vsel %vm2794_vm8, 65537, %v2490_v17  ;;  %vm1178_vm10 = vmpackc.low %vm1166_vm6, %vm1166_vm6 }
 0x2f3   : > { %1300 = vrot.lane.b32.xlu0 %v1283_v8, %s2494_s26  ;;  %v2119_v3 = vcombine.low %v1270_v1, %v1271_v6  ;;  %v1181_v15 = vsel %vm1177_vm9, 65537, %v2490_v17  ;;  %1288 = vrot.lane.b32.xlu1 %v1223_v10, %s2492_s22  ;;  %vm1179_vm11 = vmpackc.low %vm1167_vm7, %vm1167_vm7  ;;  %v1182_v18 = vsel %vm1178_vm10, 65537, %v2490_v17  ;;  %vm1251_vm8 = vcmp.ne.s16.totalorder %v2118_v9, 0 }
 0x2f4   : > { %2304 = vmatmul.mubr.f32.vlgmr.msra.gmra.mrb[4].mxu0 %v1429_v31  ;;  %v2113_v4 = vcombine.low %v1180_v13, %v1181_v15  ;;  %v1183_v20 = vsel %vm1179_vm11, 65537, %v2490_v17  ;;  %2328 = vmatpush3.bf16.msra.mxu1 %v2425_v59  ;;  %v1253_v21 = vsel %vm1251_vm8, %v2816_v44, 0  ;;  %vm1308_vm14 = vcmask 130048  }
 0x2f5   : > { %2306 = vmatprep.mubr.f32.mxu0 %v1439_v60  ;;  %2310 = vmatpush3.msra.mxu0 %v2663_v38  ;;  %vm2859_vm4 = vcmp.ne.s16.totalorder %v2119_v3, 0  ;;  %v2114_v38 = vcombine.low %v1182_v18, %v1183_v20  ;;  %vm1313_vm2 = vcmask 195584   ;;  %vm1938_vm5 = vcmask 261120  }
 0x2f6   : > { %v1282_v14 = vsel %vm2859_vm4, %v2749_v33, 0  ;;  %2317 = vmatprep.subr.mxu0 %v2655_v36  ;;  %vm2869_vm12 = vcmp.ne.s16.totalorder %v2113_v4, 0 }
 0x2f7   : > { %v1192_v22 = vsel %vm2869_vm12, %v2749_v33, 0  ;;  %1294 = vrot.lane.b32.xlu1 %v1253_v21, %s2493_s25  ;;  %vm2880_vm13 = vcmp.ne.s16.totalorder %v2114_v38, 0  ;;  %s2430_s25 = sshll.u32 %s2495_s24, 4  ;;  %s2431_s25 = int_to_ptr.vmem [resolvable:$false] %s2430_s25 }
 0x2f8   : > { %2307 = vmatmul.mubr.f32.gmra.mrb[6].mxu0 %v1449_v49  ;;  %v1193_v23 = vsel %vm2880_vm13, %v2816_v44, 0  ;;  %p2433_p1 = scmp.lt.s32.totalorder %s2908_s17, %s2431_s25 }
 0x2f9   : > { %2311 = vmatprep.mubr.msk.f32.mxu0 %vm1079_vm1, %v2686_v2 }
 0x2fb   : > { %1298 = vrot.lane.b32.xlu1 %v1282_v14, %s2494_s26  ;;  %s2432_s26 = scalar_lea.vmem %s2431_s25, 1024 }
 0x2fc   : > { %2312 = vmatmul.mubr.msk.f32.vlgmr.msra.gmra.mrb[4].mxu0 %vm1079_vm1, %v2708_v11  ;;  %p2434_p2 = scmp.lt.s32.totalorder %s2432_s26, %s2426_s23 }
 0x2fd   : > { %2314 = vmatprep.mubr.msk.f32.mxu0 %vm1079_vm1, %v2710_v12  ;;  %2318 = vmatpush3.msra.mxu0 %v2655_v36 }
 0x2fe   : > { %p2435_p3 = por %p2434_p2, %p2433_p1 }
 0x300   : > { %2315 = vmatmul.mubr.msk.f32.gmra.mrb[6].mxu0 %vm1079_vm1, %v2739_v28  ;;  %p2436_p4 = pnand %p2435_p3, %p2429_p0 }
 0x301   : > { %2319 = vmatprep.mubr.msk.f32.mxu0 %vm1079_vm1, %v2686_v2 }
 0x304   : > { %2320 = vmatmul.mubr.msk.f32.vlgmr.msra.gmra.mrb[4].mxu0 %vm1079_vm1, %v2708_v11 }
 0x305   : > { %2322 = vmatprep.mubr.msk.f32.mxu0 %vm1079_vm1, %v2710_v12 }
 0x308   : > { %2323 = vmatmul.mubr.msk.f32.gmra.mrb[6].mxu0 %vm1079_vm1, %v2739_v28 }
 0x35d   : > { %v1287_v24 = vpop.permute.xlu1 %1286 }
 0x35e   : > { %v1304_v29 = vsel %vm473_vm0, %v1192_v22, %v1287_v24 }
 0x361   : > { %v1293_v25 = vpop.permute.xlu1 %1292 }
 0x362   : > { %v1310_v30 = vsel %vm1308_vm14, %v1304_v29, %v1293_v25 }
 0x365   : > { %v1289_v26 = vpop.permute.xlu1 %1288  ;;  %v1301_v31 = vpop.permute.xlu0 %1300 }
 0x366   : > { %v1307_v36 = vsel %vm473_vm0, %v1193_v23, %v1289_v26 }
 0x369   : > { %v1295_v27 = vpop.permute.xlu1 %1294 }
 0x36a   : > { %v1312_v2 = vsel %vm1308_vm14, %v1307_v36, %v1295_v27 }
 0x36b   : > { %v1317_v12 = vsel %vm1313_vm2, %v1312_v2, %v1301_v31 }
 0x36d   : > { %v1299_v11 = vpop.permute.xlu1 %1298 }
 0x36e   : > { %v1315_v32 = vsel %vm1313_vm2, %v1310_v30, %v1299_v11 }
 0x36f   : > { %2329 = vmatprep.mubr.msk.bf16.mxu1 %vm1938_vm5, %v1315_v32 }
 0x370   : > { %2330 = vmatmul.mubr.msk.bf16.vlgmr.msra.gmra.mrb[8].mxu1 %vm1938_vm5, %v1317_v12 }
 0x3c0   : > { %v2281_v28 = vpop.f32.mrb[4].mxu1 }
 0x3c1   : > { %v1423_v33 = vpop.f32.mrb[5].mxu1 }
 0x3c4   : > { %v2284_v60 = vpop.f32.mrb[6].mxu1 }
 0x3c5   : > { %v1443_v34 = vpop.f32.mrb[7].mxu1 }
 0x3d7   : > { %v2321_v35 = vpop.f32.mrb[4].mxu0 }
 0x3d8   : > { %v2333_v37 = vadd.f32 %v2321_v35, %v2281_v28  ;;  %v1904_v39 = vpop.f32.mrb[5].mxu0 }
 0x3d9   : > { %v2334_v41 = vadd.f32 %v1904_v39, %v1423_v33 }
 0x3db   : > { %v2324_v42 = vpop.f32.mrb[6].mxu0 }
 0x3dc   : > { %v2335_v43 = vadd.f32 %v2324_v42, %v2284_v60  ;;  %v1916_v45 = vpop.f32.mrb[7].mxu0 }
 0x3dd   : > { %v2336_v46 = vadd.f32 %v1916_v45, %v1443_v34 }
 0x443   : > { %v2331_v47 = vpop.f32.mrb[8].mxu1 }
 0x444   : > { %v1986_v48 = vadd.f32 %v2336_v46, %v2331_v47  ;;  %v1977_v49 = vpop.f32.mrb[9].mxu1 }
 0x445   : > { %v1978_v50 = vadd.f32 %v2334_v41, %v1977_v49  ;;  %v2332_v51 = vpop.f32.mrb[10].mxu1 }
 0x446   : > { %1994 = vst [vmem:[%s328_s13 + $0x10] sm:$0xff] %v1986_v48  ;;  %v1989_v52 = vadd.f32 %v2335_v43, %v2332_v51  ;;  %v1980_v53 = vpop.f32.mrb[11].mxu1 }
 0x447   : > { %1992 = vst [vmem:[%s328_s13] sm:$0xff] %v1978_v50  ;;  %v1981_v54 = vadd.f32 %v2333_v37, %v1980_v53 }
 0x448   : > { %1995 = vst [vmem:[%s328_s13 + $0x18] sm:$0xff] %v1989_v52 }
 0x449   : > { %1993 = vst [vmem:[%s328_s13 + $0x8] sm:$0xff] %v1981_v54 }
 0x44a   : > { %2439 = shalt.err (!%p2436_p4)
}
 0x44b   : > { %s2440_s10 = scalar_lea.hbm %s2913_s20, 512  ;;  %s2444_s18 = scalar_lea.hbm %s2965_s8, 1024 }
 0x44c   : > { %p2441_p7 = scmp.ne.s32.totalorder %s2913_s20, %s2440_s10  ;;  %p2445_p10 = scmp.lt.u32.totalorder %s2913_s20, %s2965_s8 }
 0x44d   : > { %p2446_p11 = scmp.lt.u32.totalorder %s2444_s18, %s2440_s10  ;;  %p2448_p13 = scmp.lt.u32.totalorder %s2440_s10, %s2913_s20 }
 0x44e   : > { %p2442_p8 = pnand %p2441_p7, %p2580_p5 }
 0x44f   : > { %p2447_p12 = por %p2446_p11, %p2445_p10 }
 0x450   : > { %p2443_p9 = pneg %p2442_p8 }
 0x451   : > { %p2449_p0 = por %p2448_p13, %p2447_p12 }
 0x453   : > { %p2450_p1 = pnand %p2449_p0, %p2443_p9 }
 0x455   : > { %2453 = shalt.err (!%p2450_p1)
}
 0x456   : > { %s2496_s23 = smov 128  }
 0x457   : > { %2373 = dma.vmem_to_hbm [thread:$0]  (%p2580_p5), %s2908_s17, 512, %s2913_s20, %s2915_s9, %s2496_s23, %s2496_s23, %s2492_s22  }
 0x458 PF: > { %p2379_p2 = scmp.ge.s32.totalorder %s2488_s30, 2  ;;  %s2025_s24 = sand.u32 1, %s2476_s27  }
 0x459   : > { %s2026_s25 = scalar_lea.sflag [#allocation3], %s2025_s24 }
 0x45a   : > { %p2376_p3 = pnand %p2379_p2, %p2584_p6 }
 0x45c   : > { %2471 = dma.done.wait (!%p2376_p3), %s2026_s25, 512  }
 0x45d   : > { %2473 = vsyncadd (!%p2376_p3), %s2026_s25, 4294966784  ;;  %p18_p4 = scmp.ge.s32.totalorder %s2567_s11, 4   ;;  %s2984_s27 = smov %s2480_s28 }
 0x45e   : > { %s2985_s28 = smov %s2484_s29  ;;  %s2986_s29 = smov %s2578_s14 }
 0x45f   : > { %s2987_s30 = smov %s2567_s11  ;;  %20 = sbr.rel (!%p18_p4) target bundleno = 3 (0x3), region = 93 }
 0x466   :  { %2031 = vsyncpa [#allocation3], 1 }
 0x467   :  { %2033 = vsyncpa [#allocation3 + $0x1], 1 }

// kernel: tpu_custom_call.1
= control target key start
LH: loop header
LB: loop body
LE: loop exit
PB: predicated region body
PF: predicated region fallthrough
CT: control target
= control target key end

     0   :  { %13 = vsyncpa [#allocation3], 0  ;;  %s2957_s0 = inlined_call_operand.vmem [shape: s8[64,64], index: 0, kind: input, shape index: {}]   ;;  %s2958_s1 = inlined_call_operand.vmem [shape: bf16[64,8], index: 1, kind: input, shape index: {}]   ;;  %s2959_s2 = inlined_call_operand.vmem [shape: f32[64,1], index: 2, kind: input, shape index: {}]   ;;  %s2960_s3 = inlined_call_operand.vmem [shape: f32[64,8], index: 3, kind: input, shape index: {}]   ;;  %s2961_s4 = inlined_call_operand.vmem [shape: f32[4,8], index: 4, kind: input, shape index: {}]   ;;  %s2962_s5 = inlined_call_operand.vmem [shape: f32[1,4], index: 5, kind: input, shape index: {}]   ;;  %s2963_s6 = inlined_call_operand.vmem [shape: bf16[32,128], index: 6, kind: input, shape index: {}]   ;;  %s2964_s7 = inlined_call_operand.vmem [shape: f32[4,128], index: 7, kind: input, shape index: {}]   ;;  %s2965_s8 = inlined_call_operand.hbm [shape: f32[64,128], index: 8, kind: output, shape index: {}]  }
   0x1   :  { %15 = vsyncpa [#allocation3 + $0x1], 0  ;;  %s2542_s27 = smov 0   ;;  %s2544_s28 = smov 0  }
   0x2   :  { %s2546_s29 = smov 0   ;;  %s2548_s30 = smov 0  }
   0x3 LB: > { %s2563_s9 = sadd.s32 4294967295, %s2488_s30   ;;  %s2096_s10 = sadd.s32 4294967294, %s2488_s30   ;;  %s2488_s30 = sphi %s2548_s30, %s2987_s30   ;;  %s2484_s29 = sphi %s2546_s29, %s2986_s29   ;;  %s2480_s28 = sphi %s2544_s28, %s2985_s28   ;;  %s2476_s27 = sphi %s2542_s27, %s2984_s27  }
   0x4   : > { %s2567_s11 = sadd.s32 1, %s2488_s30   ;;  %s211_s12 = sadd.s32 1, %s2484_s29 }
   0x5   : > { %s208_s13 = ssub.s32 %s2488_s30, %s2567_s11  ;;  %p221_p0 = scmp.ne.s32.totalorder %s2484_s29, %s2480_s28 }
   0x6   : > { %p209_p1 = scmp.eq.s32.totalorder %s208_s13, 0  ;;  %p222_p2 = scmp.eq.s32.totalorder %s2563_s9, 1 }
   0x7   : > { %p227_p3 = scmp.ne.s32.totalorder %s2480_s28, %s2476_s27  ;;  %p228_p4 = scmp.eq.s32.totalorder %s2096_s10, 1 }
   0x8   : > { %s2578_s14 = scalar_select %p209_p1, %s2484_s29, %s211_s12  }
   0x9   : > { %p2580_p5 = por %p222_p2, %p221_p0  ;;  %p2584_p6 = por %p228_p4, %p227_p3 }
   0xa   : > { %p2099_p7 = scmp.ge.s32.totalorder %s2488_s30, 1  ;;  %p286_p8 = scmp.lt.s32.totalorder %s2488_s30, 3 }
   0xc   : > { %p287_p9 = pnand %p2099_p7, %p286_p8 }
   0xd   : > { %v472_v0 = vld [vmem:[%s2961_s4] sm:$0xf] (!%p287_p9)  ;;  %vm473_vm0 = vcmask (!%p287_p9), 64512   ;;  %s2102_s19 = sshll.u32 (!%p287_p9), %s2563_s9, 2  ;;  %vm1079_vm1 = vcmask (!%p287_p9), 31744   ;;  %v2421_v53 = vld [vmem:[%s2958_s1 + $0x8] sm:$0xff] (!%p287_p9)   ;;  %v1092_v59 = vlaneseq (!%p287_p9) }
   0xe   : > { %290 = sbr.rel (%p287_p9) target bundleno = 1112 (0x458), region = 52  ;;  %v487_v1 = vsel (!%p287_p9), %vm473_vm0, %v472_v0, 0  ;;  %p334_p10 = scmp.lt.s32.totalorder (!%p287_p9), %s2102_s19, 7  ;;  %v2112_v37 = vld [vmem:[%s2962_s5] ss:$0 sm:$0xff] (!%p287_p9)  ;;  %v2422_v54 = vld [vmem:[%s2958_s1 + $0x10] sm:$0xff] (!%p287_p9)  }
   0xf   : > { %v2595_v2 = vand.u32 (!%p287_p9), 4294901760, %v487_v1  ;;  %v2420_v52 = vld [vmem:[%s2958_s1] sm:$0xff] (!%p287_p9)   ;;  %p329_p11 = scmp.lt.s32.totalorder (!%p287_p9), %s2563_s9, 1  ;;  %vm384_vm2 = vcmask (!%p287_p9), 523264   ;;  %v2423_v57 = vld [vmem:[%s2958_s1 + $0x18] sm:$0xff] (!%p287_p9)   ;;  %v2640_v60 = vand.u32 (!%p287_p9), 127, %v1092_v59 }
  0x10   : > { %2217 = vmatprep.subr.bf16.mxu0 (!%p287_p9), %v2420_v52  ;;  %vm1347_vm11 = vcmask (!%p287_p9), 1043456   ;;  %s2494_s26 = smov (!%p287_p9), 24   ;;  %s326_s10 = sand.u32 (!%p287_p9), 1, %s2480_s28  }
  0x11   : > { %2229 = vmatprep.subr.mxu1 (!%p287_p9), %v2595_v2  ;;  %v597_v3 = vsub.f32 (!%p287_p9), %v487_v1, %v2595_v2  ;;  %2218 = vmatpush3.bf16.msra.mxu0 (!%p287_p9), %v2420_v52  ;;  %s2100_s12 = sshll.u32 (!%p287_p9), %s326_s10, 5  ;;  %s2146_s18 = sshll.u32 (!%p287_p9), %s2563_s9, 9 }
  0x12   : > { %2230 = vmatpush3.xpose.msra.mxu1 (!%p287_p9), %v2595_v2  ;;  %2219 = vmatprep.subr.bf16.mxu0 (!%p287_p9), %v2421_v53  ;;  %s328_s13 = scalar_lea.vmem (!%p287_p9), [#allocation2], %s2100_s12  ;;  %s2495_s24 = smov (!%p287_p9), [#allocation2]  }
  0x13   : > { %v598_v4 = vand.u32 (!%p287_p9), 4294901760, %v597_v3 }
  0x15   : > { %s2989_s19 = smov (!%p334_p10, %s2102_s19), 7  ;;  %v599_v9 = vsub.f32 %v597_v3, %v598_v4  ;;  %2220 = vmatpush3.bf16.msra.mxu0 %v2421_v53 }
  0x16   : > { %s2103_s20 = sshll.u32 %s2989_s19, 3  ;;  %2221 = vmatprep.subr.bf16.mxu0 %v2422_v54 }
  0x17   : > { %s343_s23 = scalar_lea.vmem %s2960_s3, %s2103_s20  ;;  %v600_v17 = vand.u32 4294901760, %v599_v9  ;;  %s337_s21 = scalar_lea.vmem %s2959_s2, %s2103_s20 }
  0x18   : > { %v468_v5 = vld [vmem:[%s343_s23] sm:$0xff]  ;;  %v469_v6 = vld [vmem:[%s343_s23 + $0x8] sm:$0xff]  ;;  %v470_v7 = vld [vmem:[%s343_s23 + $0x10] sm:$0xff]  ;;  %s330_s17 = scalar_select %p329_p11, %s2563_s9, 1 }
  0x19   : > { %v475_v8 = vsel %vm473_vm0, %v468_v5, 0  ;;  %v478_v10 = vsel %vm473_vm0, %v469_v6, 0  ;;  %v481_v11 = vsel %vm473_vm0, %v470_v7, 0  ;;  %v471_v12 = vld [vmem:[%s343_s23 + $0x18] sm:$0xff]  ;;  %2237 = vmatprep.subr.mxu1 %v600_v17  ;;  %2222 = vmatpush3.bf16.msra.mxu0 %v2422_v54  ;;  %s2913_s20 = scalar_lea.hbm %s2965_s8, %s2146_s18  ;;  %s2915_s9 = scalar_lea.sflag [#allocation3], %s326_s10 }
  0x1a   : > { %v555_v13 = vand.u32 4294901760, %v475_v8  ;;  %v565_v14 = vand.u32 4294901760, %v478_v10  ;;  %v575_v15 = vand.u32 4294901760, %v481_v11  ;;  %v484_v16 = vsel %vm473_vm0, %v471_v12, 0  ;;  %s2101_s22 = sshll.u32 %s330_s17, 3  ;;  %2223 = vmatprep.subr.bf16.mxu0 %v2423_v57  ;;  %s2010_s17 = sshll.u32 %s328_s13, 4  ;;  %s2908_s17 = int_to_ptr.vmem [resolvable:$true] %s2010_s17 }
  0x1b   : > { %v585_v18 = vand.u32 4294901760, %v484_v16  ;;  %s332_s25 = scalar_lea.vmem %s2957_s0, %s2101_s22  ;;  %s2492_s22 = smov 8  }
  0x1c   : > { %v556_v19 = vsub.f32 %v475_v8, %v555_v13  ;;  %v566_v20 = vsub.f32 %v478_v10, %v565_v14  ;;  %v576_v21 = vsub.f32 %v481_v11, %v575_v15  ;;  %v349_v55 = vld [vmem:[%s332_s25] sm:$0xff]  ;;  %s2493_s25 = smov 16   ;;  %s2426_s23 = scalar_lea.vmem %s2908_s17, 512 }
  0x1d   : > { %v586_v22 = vsub.f32 %v484_v16, %v585_v18  ;;  %v350_v56 = vunpack.c.l.s8.bf16 %v349_v55  ;;  %v351_v58 = vunpack.c.h.s8.bf16 %v349_v55  ;;  %2224 = vmatpush3.bf16.msra.mxu0 %v2423_v57  ;;  %p2427_p12 = scmp.ne.s32.totalorder %s2908_s17, %s2426_s23 }
  0x1e   : > { %v557_v23 = vand.u32 4294901760, %v556_v19  ;;  %v567_v24 = vand.u32 4294901760, %v566_v20  ;;  %v577_v25 = vand.u32 4294901760, %v576_v21 }
  0x1f   : > { %v587_v26 = vand.u32 4294901760, %v586_v22  ;;  %2225 = vmatprep.mubr.msk.bf16.mxu0 %vm384_vm2, %v350_v56  ;;  %p2428_p13 = pnand %p2427_p12, %p2580_p5 }
  0x20   : > { %v558_v27 = vsub.f32 %v556_v19, %v557_v23  ;;  %v568_v28 = vsub.f32 %v566_v20, %v567_v24  ;;  %v578_v29 = vsub.f32 %v576_v21, %v577_v25  ;;  %2226 = vmatmul.mubr.msk.bf16.vlgmr.msra.gmra.mrb[0].mxu0 %vm384_vm2, %v351_v58 }
  0x21   : > { %v588_v30 = vsub.f32 %v586_v22, %v587_v26  ;;  %p2429_p0 = pneg %p2428_p13 }
  0x22   : > { %v559_v31 = vand.u32 4294901760, %v558_v27  ;;  %v569_v32 = vand.u32 4294901760, %v568_v28  ;;  %v579_v33 = vand.u32 4294901760, %v578_v29 }
  0x23   : > { %v589_v34 = vand.u32 4294901760, %v588_v30 }
  0x24   : > { %2231 = vmatprep.mubr.f32.mxu1 %v559_v31 }
  0x25   : > { %2232 = vmatmul.mubr.f32.vlgmr.msra.gmra.mrb[0].mxu1 %v569_v32 }
  0x26   : > { %2238 = vmatpush3.xpose.msra.mxu1 %v600_v17  ;;  %2234 = vmatprep.mubr.f32.mxu1 %v579_v33  ;;  %v2490_v17 = vmov 0  }
  0x27   : > { %2245 = vmatprep.subr.mxu1 %v597_v3  ;;  %2419 = vset.pattern.permute.xlu1 %v2490_v17 }
  0x28   : > { %2418 = vset.pattern.permute.xlu0 %v2490_v17 }
  0x29   : > { %2235 = vmatmul.mubr.f32.gmra.mrb[2].mxu1 %v589_v34  ;;  %v1334_v34 = vld [vmem:[%s2964_s7] sm:$0xf] }
  0x2a   : > { %2239 = vmatprep.mubr.f32.mxu1 %v555_v13 }
  0x2d   : > { %2240 = vmatmul.mubr.f32.vlgmr.msra.gmra.mrb[0].mxu1 %v565_v14 }
  0x2e   : > { %2246 = vmatpush3.xpose.msra.mxu1 %v597_v3  ;;  %2242 = vmatprep.mubr.f32.mxu1 %v575_v15 }
  0x2f   : > { %2253 = vmatprep.subr.mxu1 %v2595_v2 }
  0x31   : > { %2243 = vmatmul.mubr.f32.gmra.mrb[2].mxu1 %v585_v18 }
  0x32   : > { %2247 = vmatprep.mubr.f32.mxu1 %v556_v19 }
  0x35   : > { %2248 = vmatmul.mubr.f32.vlgmr.msra.gmra.mrb[0].mxu1 %v566_v20 }
  0x36   : > { %2254 = vmatpush3.xpose.msra.mxu1 %v2595_v2  ;;  %2250 = vmatprep.mubr.f32.mxu1 %v576_v21 }
  0x37   : > { %2261 = vmatprep.subr.mxu1 %v598_v4 }
  0x39   : > { %2251 = vmatmul.mubr.f32.gmra.mrb[2].mxu1 %v586_v22 }
  0x3a   : > { %2255 = vmatprep.mubr.f32.mxu1 %v557_v23 }
  0x3d   : > { %2256 = vmatmul.mubr.f32.vlgmr.msra.gmra.mrb[0].mxu1 %v567_v24 }
  0x3e   : > { %2262 = vmatpush3.xpose.msra.mxu1 %v598_v4  ;;  %2258 = vmatprep.mubr.f32.mxu1 %v577_v25 }
  0x3f   : > { %2269 = vmatprep.subr.mxu1 %v2595_v2 }
  0x41   : > { %2259 = vmatmul.mubr.f32.gmra.mrb[2].mxu1 %v587_v26 }
  0x42   : > { %2263 = vmatprep.mubr.f32.mxu1 %v555_v13 }
  0x45   : > { %2264 = vmatmul.mubr.f32.vlgmr.msra.gmra.mrb[0].mxu1 %v565_v14 }
  0x46   : > { %2270 = vmatpush3.xpose.msra.mxu1 %v2595_v2  ;;  %2266 = vmatprep.mubr.f32.mxu1 %v575_v15 }
  0x49   : > { %2267 = vmatmul.mubr.f32.gmra.mrb[2].mxu1 %v585_v18 }
  0x4a   : > { %2271 = vmatprep.mubr.f32.mxu1 %v555_v13 }
  0x4d   : > { %2272 = vmatmul.mubr.f32.vlgmr.msra.gmra.mrb[0].mxu1 %v565_v14 }
  0x4e   : > { %2274 = vmatprep.mubr.f32.mxu1 %v575_v15 }
  0x51   : > { %2275 = vmatmul.mubr.f32.gmra.mrb[2].mxu1 %v585_v18 }
 0x120   : > { %v2273_v35 = vpop.f32.mrb[0].mxu1 }
 0x121   : > { %v1042_v36 = vpop.f32.mrb[1].mxu1  ;;  %v1066_v38 = vmul.f32 2.0, %v2273_v35  ;;  %v1349_v35 = vsel %vm1347_vm11, %v1334_v34, 0 }
 0x122   : > { %v1065_v39 = vmul.f32 2.0, %v1042_v36  ;;  %v2655_v36 = vand.u32 4294901760, %v1349_v35 }
 0x123   : > { %v1076_v46 = vsub.f32 %v2112_v37, %v1066_v38 }
 0x124   : > { %v2276_v40 = vpop.f32.mrb[2].mxu1  ;;  %v1075_v41 = vsub.f32 %v2112_v37, %v1065_v39  ;;  %2277 = vmatprep.subr.mxu1 %v2655_v36 }
 0x125   : > { %v1054_v42 = vpop.f32.mrb[3].mxu1  ;;  %v1068_v43 = vmul.f32 2.0, %v2276_v40  ;;  %v1083_v48 = vsel %vm1079_vm1, %v1076_v46, inf  ;;  %2278 = vmatpush3.msra.mxu1 %v2655_v36  ;;  %v2672_v40 = vpop.f32.mrb[0].mxu0 }
 0x126   : > { %v1067_v44 = vmul.f32 2.0, %v1054_v42  ;;  %v1080_v45 = vsel %vm1079_vm1, %v1075_v41, inf }
 0x127   : > { %1081 = vmin.xlane.f32.xlu0 %v1080_v45  ;;  %v1078_v50 = vsub.f32 %v2112_v37, %v1068_v43  ;;  %v441_v43 = vld [vmem:[%s337_s21 + $0x8] sm:$0xff]  ;;  %v440_v45 = vld [vmem:[%s337_s21] sm:$0xff] }
 0x128   : > { %v1077_v47 = vsub.f32 %v2112_v37, %v1067_v44  ;;  %v2658_v37 = vsub.f32 %v1349_v35, %v2655_v36 }
 0x129   : > { %v1089_v51 = vsel %vm1079_vm1, %v1078_v50, inf }
 0x12a   : > { %v1086_v49 = vsel %vm1079_vm1, %v1077_v47, inf  ;;  %v2663_v38 = vand.u32 4294901760, %v2658_v37 }
 0x12b   : > { %1084 = vmin.xlane.f32.xlu0 %v1083_v48  ;;  %1087 = vmin.xlane.f32.xlu1 %v1086_v49  ;;  %v443_v48 = vld [vmem:[%s337_s21 + $0x18] sm:$0xff] }
 0x12c   : > { %v1461_v39 = vsub.f32 %v2658_v37, %v2663_v38 }
 0x12e   : > { %v1462_v42 = vand.u32 4294901760, %v1461_v39 }
 0x12f   : > { %1090 = vmin.xlane.f32.xlu1 %v1089_v51 }
 0x130   : > { %2285 = vmatprep.subr.mxu0 %v1462_v42 }
 0x131   : > { %2286 = vmatpush3.msra.mxu0 %v1462_v42 }
 0x132   : > { %2293 = vmatprep.subr.mxu0 %v2658_v37 }
 0x1b4   : > { %v1082_v61 = vpop.xlane.xlu0 %1081 }
 0x1b5   : > { %vm1094_vm3 = vcmp.eq.f32.partialorder %v1075_v41, %v1082_v61  ;;  %v2674_v41 = vpop.f32.mrb[1].mxu0 }
 0x1b6   : > { %v1098_v62 = vsel %vm1094_vm3, %v2640_v60, 4  ;;  %v2676_v44 = vpop.f32.mrb[2].mxu0 }
 0x1b7   : > { %v1102_v63 = vsel %vm1079_vm1, %v1098_v62, 2147483647 }
 0x1b8   : > { %v1085_v0 = vpop.xlane.xlu0 %1084  ;;  %v1088_v1 = vpop.xlane.xlu1 %1087  ;;  %v1104_v2 = vshra.s32 %v1102_v63, 16  ;;  %v1103_v18 = vand.u32 65535, %v1102_v63 }
 0x1b9   : > { %vm1095_vm4 = vcmp.eq.f32.partialorder %v1076_v46, %v1085_v0  ;;  %vm1096_vm5 = vcmp.eq.f32.partialorder %v1077_v47, %v1088_v1  ;;  %v2678_v46 = vpop.f32.mrb[3].mxu0  ;;  %v442_v47 = vld [vmem:[%s337_s21 + $0x10] sm:$0xff]  ;;  %v2491_v1 = vmov 0.0  }
 0x1ba   : > { %v1099_v3 = vsel %vm1095_vm4, %v2640_v60, 4  ;;  %v1100_v4 = vsel %vm1096_vm5, %v2640_v60, 4  ;;  %v1106_v5 = vcvt.s32.f32 %v1104_v2  ;;  %v1105_v20 = vcvt.s32.f32 %v1103_v18 }
 0x1bb   : > { %v1117_v6 = vsel %vm1079_vm1, %v1099_v3, 2147483647  ;;  %v1132_v7 = vsel %vm1079_vm1, %v1100_v4, 2147483647 }
 0x1bc   : > { %1107 = vmin.xlane.f32.xlu0 %v1106_v5  ;;  %v1091_v8 = vpop.xlane.xlu1 %1090  ;;  %v1119_v9 = vshra.s32 %v1117_v6, 16  ;;  %v1134_v10 = vshra.s32 %v1132_v7, 16  ;;  %v1133_v21 = vand.u32 65535, %v1132_v7  ;;  %v1118_v22 = vand.u32 65535, %v1117_v6 }
 0x1bd   : > { %vm1097_vm6 = vcmp.eq.f32.partialorder %v1078_v50, %v1091_v8 }
 0x1be   : > { %v1101_v11 = vsel %vm1097_vm6, %v2640_v60, 4  ;;  %v1121_v12 = vcvt.s32.f32 %v1119_v9  ;;  %v1136_v13 = vcvt.s32.f32 %v1134_v10  ;;  %v1135_v26 = vcvt.s32.f32 %v1133_v21 }
 0x1bf   : > { %v1147_v14 = vsel %vm1079_vm1, %v1101_v11, 2147483647  ;;  %v1120_v27 = vcvt.s32.f32 %v1118_v22 }
 0x1c0   : > { %1122 = vmin.xlane.f32.xlu1 %v1121_v12  ;;  %1137 = vmin.xlane.f32.xlu0 %v1136_v13  ;;  %v1149_v15 = vshra.s32 %v1147_v14, 16  ;;  %v1148_v28 = vand.u32 65535, %v1147_v14 }
 0x1c2   : > { %v1151_v16 = vcvt.s32.f32 %v1149_v15  ;;  %v1150_v32 = vcvt.s32.f32 %v1148_v28 }
 0x1c4   : > { %1152 = vmin.xlane.f32.xlu1 %v1151_v16 }
 0x249   : > { %v1108_v19 = vpop.xlane.xlu0 %1107 }
 0x24a   : > { %vm1109_vm7 = vcmp.eq.f32.partialorder %v1106_v5, %v1108_v19  ;;  %v1114_v49 = vcvt.f32.s32 %v1108_v19 }
 0x24b   : > { %v1110_v23 = vsel %vm1109_vm7, %v1105_v20, inf }
 0x24c   : > { %1111 = vmin.xlane.f32.xlu0 %v1110_v23  ;;  %v1115_v53 = vshll.u32 %v1114_v49, 16 }
 0x24d   : > { %v1138_v24 = vpop.xlane.xlu0 %1137  ;;  %v1123_v25 = vpop.xlane.xlu1 %1122 }
 0x24e   : > { %vm1139_vm8 = vcmp.eq.f32.partialorder %v1136_v13, %v1138_v24  ;;  %vm1124_vm9 = vcmp.eq.f32.partialorder %v1121_v12, %v1123_v25  ;;  %v1144_v50 = vcvt.f32.s32 %v1138_v24  ;;  %v1129_v51 = vcvt.f32.s32 %v1123_v25 }
 0x24f   : > { %v1140_v29 = vsel %vm1139_vm8, %v1135_v26, inf  ;;  %v1125_v30 = vsel %vm1124_vm9, %v1120_v27, inf }
 0x250   : > { %1141 = vmin.xlane.f32.xlu0 %v1140_v29  ;;  %1126 = vmin.xlane.f32.xlu1 %v1125_v30  ;;  %v1145_v57 = vshll.u32 %v1144_v50, 16  ;;  %v1130_v58 = vshll.u32 %v1129_v51, 16 }
 0x251   : > { %v1153_v31 = vpop.xlane.xlu1 %1152 }
 0x252   : > { %vm1154_vm10 = vcmp.eq.f32.partialorder %v1151_v16, %v1153_v31  ;;  %v1159_v55 = vcvt.f32.s32 %v1153_v31 }
 0x253   : > { %v1155_v33 = vsel %vm1154_vm10, %v1150_v32, inf  ;;  %v2424_v32 = vld [vmem:[%s2963_s6] sm:$0xff]  }
 0x254   : > { %1156 = vmin.xlane.f32.xlu1 %v1155_v33  ;;  %v1160_v0 = vshll.u32 %v1159_v55, 16  ;;  %2325 = vmatprep.subr.bf16.mxu1 %v2424_v32 }
 0x265   : > { %451 = vperm.xlu1 %2419, %v441_v43  }
 0x266   : > { %446 = vperm.xlu0 %2418, %v440_v45  }
 0x269   : > { %456 = vperm.xlu1 %2419, %v442_v47  }
 0x26d   : > { %461 = vperm.xlu1 %2419, %v443_v48  }
 0x2d9   : > { %v1112_v52 = vpop.xlane.xlu0 %1111 }
 0x2da   : > { %v1113_v54 = vcvt.f32.s32 %v1112_v52 }
 0x2dc   : > { %v2681_v56 = vadd.s32 %v1115_v53, %v1113_v54 }
 0x2dd   : > { %v1142_v59 = vpop.xlane.xlu0 %1141  ;;  %v1127_v61 = vpop.xlane.xlu1 %1126 }
 0x2de   : > { %v1143_v62 = vcvt.f32.s32 %v1142_v59  ;;  %v1128_v63 = vcvt.f32.s32 %v1127_v61  ;;  %vm1322_vm12 = vcmp.eq.s32.totalorder %v2640_v60, %v2681_v56  ;;  %vm1194_vm13 = vcmp.eq.s32.totalorder %v2681_v56, 1  ;;  %v2425_v59 = vld [vmem:[%s2963_s6 + $0x8] sm:$0xff]  }
 0x2df   : > { %v2686_v2 = vsel %vm1322_vm12, 1.0, %v2491_v1  ;;  %vm1206_vm14 = vmpackc.low %vm1194_vm13, %vm1194_vm13  ;;  %vm1224_vm15 = vcmp.eq.s32.totalorder %v2681_v56, 2  ;;  %vm1254_vm3 = vcmp.eq.s32.totalorder %v2681_v56, 3  ;;  %vm1164_vm4 = vcmp.eq.s32.totalorder %v2681_v56, 0 }
 0x2e0   : > { %v2689_v3 = vadd.s32 %v1145_v57, %v1143_v62  ;;  %v2691_v4 = vadd.s32 %v1130_v58, %v1128_v63  ;;  %v1336_v5 = vsel %vm1079_vm1, %v2686_v2, 0  ;;  %2287 = vmatprep.mubr.msk.f32.mxu0 %vm1079_vm1, %v2686_v2  ;;  %vm1236_vm2 = vmpackc.low %vm1224_vm15, %vm1224_vm15  ;;  %v1210_v8 = vsel %vm1206_vm14, 65537, %v2490_v17 }
 0x2e1   : > { %v2698_v6 = vsub.f32 %v1336_v5, %v1336_v5  ;;  %v1157_v7 = vpop.xlane.xlu1 %1156  ;;  %v1240_v9 = vsel %vm1236_vm2, 65537, %v2490_v17  ;;  %vm2767_vm15 = vmpackc.low %vm1254_vm3, %vm1254_vm3 }
 0x2e2   : > { %v1158_v10 = vcvt.f32.s32 %v1157_v7  ;;  %vm1323_vm5 = vcmp.eq.s32.totalorder %v2640_v60, %v2691_v4  ;;  %vm1324_vm6 = vcmp.eq.s32.totalorder %v2640_v60, %v2689_v3  ;;  %vm1195_vm7 = vcmp.eq.s32.totalorder %v2691_v4, 1 }
 0x2e3   : > { %v2708_v11 = vsel %vm1323_vm5, 1.0, %v2491_v1  ;;  %v2710_v12 = vsel %vm1324_vm6, 1.0, %v2491_v1  ;;  %v1419_v13 = vand.u32 4294901760, %v2698_v6  ;;  %vm1207_vm8 = vmpackc.low %vm1195_vm7, %vm1195_vm7  ;;  %vm1225_vm9 = vcmp.eq.s32.totalorder %v2691_v4, 2 }
 0x2e4   : > { %v2714_v14 = vadd.s32 %v1160_v0, %v1158_v10  ;;  %v1339_v15 = vsel %vm1079_vm1, %v2708_v11, 0  ;;  %2288 = vmatmul.mubr.msk.f32.vlgmr.msra.gmra.mrb[4].mxu0 %vm1079_vm1, %v2708_v11  ;;  %v1211_v16 = vsel %vm1207_vm8, 65537, %v2490_v17  ;;  %v1342_v18 = vsel %vm1079_vm1, %v2710_v12, 0  ;;  %vm1237_vm10 = vmpackc.low %vm1225_vm9, %vm1225_vm9 }
 0x2e5   : > { %v2723_v19 = vsub.f32 %v1339_v15, %v1339_v15  ;;  %v452_v20 = vpop.permute.xlu1 %451  ;;  %v447_v21 = vpop.permute.xlu0 %446  ;;  %2290 = vmatprep.mubr.msk.f32.mxu0 %vm1079_vm1, %v2710_v12  ;;  %v1420_v22 = vsub.f32 %v2698_v6, %v1419_v13  ;;  %2294 = vmatpush3.msra.mxu0 %v2658_v37  ;;  %v2115_v23 = vcombine.low %v1210_v8, %v1211_v16  ;;  %v1241_v24 = vsel %vm1237_vm10, 65537, %v2490_v17  ;;  %vm2794_vm8 = vmpackc.low %vm1164_vm4, %vm1164_vm4 }
 0x2e6   : > { %v465_v25 = vmul.f32 %v452_v20, %v2678_v46  ;;  %v464_v26 = vmul.f32 %v447_v21, %v2674_v41  ;;  %vm1325_vm11 = vcmp.eq.s32.totalorder %v2640_v60, %v2714_v14  ;;  %v2736_v27 = vsub.f32 %v1342_v18, %v1342_v18  ;;  %2301 = vmatprep.subr.mxu0 %v2655_v36 }
 0x2e7   : > { %v2739_v28 = vsel %vm1325_vm11, 1.0, %v2491_v1  ;;  %v1421_v29 = vand.u32 4294901760, %v1420_v22  ;;  %vm2741_vm12 = vcmp.ne.s16.totalorder %v2115_v23, 0  ;;  %v1429_v31 = vand.u32 4294901760, %v2723_v19 }
 0x2e8   : > { %v2749_v33 = vpack.c.bf16 %v465_v25, %v464_v26  ;;  %2291 = vmatmul.mubr.msk.f32.gmra.mrb[6].mxu0 %vm1079_vm1, %v2739_v28  ;;  %v1439_v60 = vand.u32 4294901760, %v2736_v27  ;;  %v2117_v34 = vcombine.low %v1240_v9, %v1241_v24  ;;  %v1345_v35 = vsel %vm1079_vm1, %v2739_v28, 0 }
 0x2e9   : > { %2279 = vmatprep.mubr.f32.mxu1 %v1421_v29  ;;  %v457_v37 = vpop.permute.xlu1 %456  ;;  %2295 = vmatprep.mubr.f32.mxu0 %v2698_v6  ;;  %v1430_v39 = vsub.f32 %v2723_v19, %v1429_v31  ;;  %v2760_v41 = vsub.f32 %v1345_v35, %v1345_v35  ;;  %vm1256_vm13 = vcmp.eq.s32.totalorder %v2689_v3, 3  ;;  %vm1257_vm14 = vcmp.eq.s32.totalorder %v2714_v14, 3 }
 0x2ea   : > { %v1222_v43 = vsel %vm2741_vm12, %v2749_v33, 0  ;;  %v1440_v45 = vsub.f32 %v2736_v27, %v1439_v60  ;;  %vm2777_vm2 = vcmp.ne.s16.totalorder %v2117_v34, 0  ;;  %vm1268_vm5 = vmpackc.low %vm1256_vm13, %vm1256_vm13  ;;  %vm1196_vm6 = vcmp.eq.s32.totalorder %v2689_v3, 1 }
 0x2eb   : > { %1286 = vrot.lane.b32.xlu1 %v1222_v43, %s2492_s22  ;;  %v1431_v47 = vand.u32 4294901760, %v1430_v39  ;;  %v1252_v48 = vsel %vm2777_vm2, %v2749_v33, 0  ;;  %v1449_v49 = vand.u32 4294901760, %v2760_v41  ;;  %vm1269_vm3 = vmpackc.low %vm1257_vm14, %vm1257_vm14  ;;  %v1272_v50 = vsel %vm1268_vm5, 65537, %v2490_v17 }
 0x2ec   : > { %2296 = vmatmul.mubr.f32.vlgmr.msra.gmra.mrb[4].mxu0 %v2723_v19  ;;  %v1441_v51 = vand.u32 4294901760, %v1440_v45  ;;  %v1273_v52 = vsel %vm1269_vm3, 65537, %v2490_v17  ;;  %vm1197_vm7 = vcmp.eq.s32.totalorder %v2714_v14, 1  ;;  %vm1208_vm9 = vmpackc.low %vm1196_vm6, %vm1196_vm6  ;;  %vm1226_vm10 = vcmp.eq.s32.totalorder %v2689_v3, 2 }
 0x2ed   : > { %2280 = vmatmul.mubr.f32.vlgmr.msra.gmra.mrb[4].mxu1 %v1431_v47  ;;  %v462_v54 = vpop.permute.xlu1 %461  ;;  %2298 = vmatprep.mubr.f32.mxu0 %v2736_v27  ;;  %v1450_v55 = vsub.f32 %v2760_v41, %v1449_v49  ;;  %v2120_v57 = vcombine.low %v1272_v50, %v1273_v52  ;;  %vm1227_vm11 = vcmp.eq.s32.totalorder %v2714_v14, 2  ;;  %v466_v56 = vmul.f32 %v2672_v40, %v457_v37  ;;  %vm1209_vm4 = vmpackc.low %vm1197_vm7, %vm1197_vm7 }
 0x2ee   : > { %v467_v58 = vmul.f32 %v2676_v44, %v462_v54  ;;  %2282 = vmatprep.mubr.f32.mxu1 %v1441_v51  ;;  %2302 = vmatpush3.msra.mxu0 %v2655_v36  ;;  %vm1255_vm12 = vcmp.eq.s32.totalorder %v2691_v4, 3  ;;  %v1212_v62 = vsel %vm1208_vm9, 65537, %v2490_v17  ;;  %v1213_v40 = vsel %vm1209_vm4, 65537, %v2490_v17  ;;  %vm1238_vm13 = vmpackc.low %vm1226_vm10, %vm1226_vm10 }
 0x2ef   : > { %1292 = vrot.lane.b32.xlu1 %v1252_v48, %s2493_s25  ;;  %v1451_v61 = vand.u32 4294901760, %v1450_v55  ;;  %2309 = vmatprep.subr.mxu0 %v2663_v38  ;;  %vm1165_vm14 = vcmp.eq.s32.totalorder %v2691_v4, 0  ;;  %vm2819_vm2 = vcmp.ne.s16.totalorder %v2120_v57, 0  ;;  %v2116_v0 = vcombine.low %v1212_v62, %v1213_v40  ;;  %vm1239_vm5 = vmpackc.low %vm1227_vm11, %vm1227_vm11 }
 0x2f0   : > { %v2816_v44 = vpack.c.bf16 %v467_v58, %v466_v56  ;;  %2299 = vmatmul.mubr.f32.gmra.mrb[6].mxu0 %v2760_v41  ;;  %v1270_v1 = vsel %vm2767_vm15, 65537, %v2490_v17  ;;  %2326 = vmatpush3.bf16.msra.mxu1 %v2424_v32  ;;  %v1242_v5 = vsel %vm1238_vm13, 65537, %v2490_v17  ;;  %v1243_v7 = vsel %vm1239_vm5, 65537, %v2490_v17  ;;  %vm1267_vm3 = vmpackc.low %vm1255_vm12, %vm1255_vm12 }
 0x2f1   : > { %2283 = vmatmul.mubr.f32.gmra.mrb[6].mxu1 %v1451_v61  ;;  %2303 = vmatprep.mubr.f32.mxu0 %v1419_v13  ;;  %vm1166_vm6 = vcmp.eq.s32.totalorder %v2689_v3, 0  ;;  %vm1167_vm7 = vcmp.eq.s32.totalorder %v2714_v14, 0  ;;  %vm1221_vm15 = vcmp.ne.s16.totalorder %v2116_v0, 0  ;;  %v2118_v9 = vcombine.low %v1242_v5, %v1243_v7  ;;  %vm1177_vm9 = vmpackc.low %vm1165_vm14, %vm1165_vm14 }
 0x2f2   : > { %v1283_v8 = vsel %vm2819_vm2, %v2816_v44, 0  ;;  %v1271_v6 = vsel %vm1267_vm3, 65537, %v2490_v17  ;;  %2327 = vmatprep.subr.bf16.mxu1 %v2425_v59  ;;  %v1223_v10 = vsel %vm1221_vm15, %v2816_v44, 0  ;;  %v1180_v13 = vsel %vm2794_vm8, 65537, %v2490_v17  ;;  %vm1178_vm10 = vmpackc.low %vm1166_vm6, %vm1166_vm6 }
 0x2f3   : > { %1300 = vrot.lane.b32.xlu0 %v1283_v8, %s2494_s26  ;;  %v2119_v3 = vcombine.low %v1270_v1, %v1271_v6  ;;  %v1181_v15 = vsel %vm1177_vm9, 65537, %v2490_v17  ;;  %1288 = vrot.lane.b32.xlu1 %v1223_v10, %s2492_s22  ;;  %vm1179_vm11 = vmpackc.low %vm1167_vm7, %vm1167_vm7  ;;  %v1182_v18 = vsel %vm1178_vm10, 65537, %v2490_v17  ;;  %vm1251_vm8 = vcmp.ne.s16.totalorder %v2118_v9, 0 }
 0x2f4   : > { %2304 = vmatmul.mubr.f32.vlgmr.msra.gmra.mrb[4].mxu0 %v1429_v31  ;;  %v2113_v4 = vcombine.low %v1180_v13, %v1181_v15  ;;  %v1183_v20 = vsel %vm1179_vm11, 65537, %v2490_v17  ;;  %2328 = vmatpush3.bf16.msra.mxu1 %v2425_v59  ;;  %v1253_v21 = vsel %vm1251_vm8, %v2816_v44, 0  ;;  %vm1308_vm14 = vcmask 130048  }
 0x2f5   : > { %2306 = vmatprep.mubr.f32.mxu0 %v1439_v60  ;;  %2310 = vmatpush3.msra.mxu0 %v2663_v38  ;;  %vm2859_vm4 = vcmp.ne.s16.totalorder %v2119_v3, 0  ;;  %v2114_v38 = vcombine.low %v1182_v18, %v1183_v20  ;;  %vm1313_vm2 = vcmask 195584   ;;  %vm1938_vm5 = vcmask 261120  }
 0x2f6   : > { %v1282_v14 = vsel %vm2859_vm4, %v2749_v33, 0  ;;  %2317 = vmatprep.subr.mxu0 %v2655_v36  ;;  %vm2869_vm12 = vcmp.ne.s16.totalorder %v2113_v4, 0 }
 0x2f7   : > { %v1192_v22 = vsel %vm2869_vm12, %v2749_v33, 0  ;;  %1294 = vrot.lane.b32.xlu1 %v1253_v21, %s2493_s25  ;;  %vm2880_vm13 = vcmp.ne.s16.totalorder %v2114_v38, 0  ;;  %s2430_s25 = sshll.u32 %s2495_s24, 4  ;;  %s2431_s25 = int_to_ptr.vmem [resolvable:$false] %s2430_s25 }
 0x2f8   : > { %2307 = vmatmul.mubr.f32.gmra.mrb[6].mxu0 %v1449_v49  ;;  %v1193_v23 = vsel %vm2880_vm13, %v2816_v44, 0  ;;  %p2433_p1 = scmp.lt.s32.totalorder %s2908_s17, %s2431_s25 }
 0x2f9   : > { %2311 = vmatprep.mubr.msk.f32.mxu0 %vm1079_vm1, %v2686_v2 }
 0x2fb   : > { %1298 = vrot.lane.b32.xlu1 %v1282_v14, %s2494_s26  ;;  %s2432_s26 = scalar_lea.vmem %s2431_s25, 1024 }
 0x2fc   : > { %2312 = vmatmul.mubr.msk.f32.vlgmr.msra.gmra.mrb[4].mxu0 %vm1079_vm1, %v2708_v11  ;;  %p2434_p2 = scmp.lt.s32.totalorder %s2432_s26, %s2426_s23 }
 0x2fd   : > { %2314 = vmatprep.mubr.msk.f32.mxu0 %vm1079_vm1, %v2710_v12  ;;  %2318 = vmatpush3.msra.mxu0 %v2655_v36 }
 0x2fe   : > { %p2435_p3 = por %p2434_p2, %p2433_p1 }
 0x300   : > { %2315 = vmatmul.mubr.msk.f32.gmra.mrb[6].mxu0 %vm1079_vm1, %v2739_v28  ;;  %p2436_p4 = pnand %p2435_p3, %p2429_p0 }
 0x301   : > { %2319 = vmatprep.mubr.msk.f32.mxu0 %vm1079_vm1, %v2686_v2 }
 0x304   : > { %2320 = vmatmul.mubr.msk.f32.vlgmr.msra.gmra.mrb[4].mxu0 %vm1079_vm1, %v2708_v11 }
 0x305   : > { %2322 = vmatprep.mubr.msk.f32.mxu0 %vm1079_vm1, %v2710_v12 }
 0x308   : > { %2323 = vmatmul.mubr.msk.f32.gmra.mrb[6].mxu0 %vm1079_vm1, %v2739_v28 }
 0x35d   : > { %v1287_v24 = vpop.permute.xlu1 %1286 }
 0x35e   : > { %v1304_v29 = vsel %vm473_vm0, %v1192_v22, %v1287_v24 }
 0x361   : > { %v1293_v25 = vpop.permute.xlu1 %1292 }
 0x362   : > { %v1310_v30 = vsel %vm1308_vm14, %v1304_v29, %v1293_v25 }
 0x365   : > { %v1289_v26 = vpop.permute.xlu1 %1288  ;;  %v1301_v31 = vpop.permute.xlu0 %1300 }
 0x366   : > { %v1307_v36 = vsel %vm473_vm0, %v1193_v23, %v1289_v26 }
 0x369   : > { %v1295_v27 = vpop.permute.xlu1 %1294 }
 0x36a   : > { %v1312_v2 = vsel %vm1308_vm14, %v1307_v36, %v1295_v27 }
 0x36b   : > { %v1317_v12 = vsel %vm1313_vm2, %v1312_v2, %v1301_v31 }
 0x36d   : > { %v1299_v11 = vpop.permute.xlu1 %1298 }
 0x36e   : > { %v1315_v32 = vsel %vm1313_vm2, %v1310_v30, %v1299_v11 }
 0x36f   : > { %2329 = vmatprep.mubr.msk.bf16.mxu1 %vm1938_vm5, %v1315_v32 }
 0x370   : > { %2330 = vmatmul.mubr.msk.bf16.vlgmr.msra.gmra.mrb[8].mxu1 %vm1938_vm5, %v1317_v12 }
 0x3c0   : > { %v2281_v28 = vpop.f32.mrb[4].mxu1 }
 0x3c1   : > { %v1423_v33 = vpop.f32.mrb[5].mxu1 }
 0x3c4   : > { %v2284_v60 = vpop.f32.mrb[6].mxu1 }
 0x3c5   : > { %v1443_v34 = vpop.f32.mrb[7].mxu1 }
 0x3d7   : > { %v2321_v35 = vpop.f32.mrb[4].mxu0 }
 0x3d8   : > { %v2333_v37 = vadd.f32 %v2321_v35, %v2281_v28  ;;  %v1904_v39 = vpop.f32.mrb[5].mxu0 }
 0x3d9   : > { %v2334_v41 = vadd.f32 %v1904_v39, %v1423_v33 }
 0x3db   : > { %v2324_v42 = vpop.f32.mrb[6].mxu0 }
 0x3dc   : > { %v2335_v43 = vadd.f32 %v2324_v42, %v2284_v60  ;;  %v1916_v45 = vpop.f32.mrb[7].mxu0 }
 0x3dd   : > { %v2336_v46 = vadd.f32 %v1916_v45, %v1443_v34 }
 0x443   : > { %v2331_v47 = vpop.f32.mrb[8].mxu1 }
 0x444   : > { %v1986_v48 = vadd.f32 %v2336_v46, %v2331_v47  ;;  %v1977_v49 = vpop.f32.mrb[9].mxu1 }
 0x445   : > { %v1978_v50 = vadd.f32 %v2334_v41, %v1977_v49  ;;  %v2332_v51 = vpop.f32.mrb[10].mxu1 }
 0x446   : > { %1994 = vst [vmem:[%s328_s13 + $0x10] sm:$0xff] %v1986_v48  ;;  %v1989_v52 = vadd.f32 %v2335_v43, %v2332_v51  ;;  %v1980_v53 = vpop.f32.mrb[11].mxu1 }
 0x447   : > { %1992 = vst [vmem:[%s328_s13] sm:$0xff] %v1978_v50  ;;  %v1981_v54 = vadd.f32 %v2333_v37, %v1980_v53 }
 0x448   : > { %1995 = vst [vmem:[%s328_s13 + $0x18] sm:$0xff] %v1989_v52 }
 0x449   : > { %1993 = vst [vmem:[%s328_s13 + $0x8] sm:$0xff] %v1981_v54 }
 0x44a   : > { %2439 = shalt.err (!%p2436_p4)
}
 0x44b   : > { %s2440_s10 = scalar_lea.hbm %s2913_s20, 512  ;;  %s2444_s18 = scalar_lea.hbm %s2965_s8, 1024 }
 0x44c   : > { %p2441_p7 = scmp.ne.s32.totalorder %s2913_s20, %s2440_s10  ;;  %p2445_p10 = scmp.lt.u32.totalorder %s2913_s20, %s2965_s8 }
 0x44d   : > { %p2446_p11 = scmp.lt.u32.totalorder %s2444_s18, %s2440_s10  ;;  %p2448_p13 = scmp.lt.u32.totalorder %s2440_s10, %s2913_s20 }
 0x44e   : > { %p2442_p8 = pnand %p2441_p7, %p2580_p5 }
 0x44f   : > { %p2447_p12 = por %p2446_p11, %p2445_p10 }
 0x450   : > { %p2443_p9 = pneg %p2442_p8 }
 0x451   : > { %p2449_p0 = por %p2448_p13, %p2447_p12 }
 0x453   : > { %p2450_p1 = pnand %p2449_p0, %p2443_p9 }
 0x455   : > { %2453 = shalt.err (!%p2450_p1)
}
 0x456   : > { %s2496_s23 = smov 128  }
 0x457   : > { %2373 = dma.vmem_to_hbm [thread:$0]  (%p2580_p5), %s2908_s17, 512, %s2913_s20, %s2915_s9, %s2496_s23, %s2496_s23, %s2492_s22  }
 0x458 PF: > { %p2379_p2 = scmp.ge.s32.totalorder %s2488_s30, 2  ;;  %s2025_s24 = sand.u32 1, %s2476_s27  }
 0x459   : > { %s2026_s25 = scalar_lea.sflag [#allocation3], %s2025_s24 }
 0x45a   : > { %p2376_p3 = pnand %p2379_p2, %p2584_p6 }
 0x45c   : > { %2471 = dma.done.wait (!%p2376_p3), %s2026_s25, 512  }
 0x45d   : > { %2473 = vsyncadd (!%p2376_p3), %s2026_s25, 4294966784  ;;  %p18_p4 = scmp.ge.s32.totalorder %s2567_s11, 4   ;;  %s2984_s27 = smov %s2480_s28 }
 0x45e   : > { %s2985_s28 = smov %s2484_s29  ;;  %s2986_s29 = smov %s2578_s14 }
 0x45f   : > { %s2987_s30 = smov %s2567_s11  ;;  %20 = sbr.rel (!%p18_p4) target bundleno = 3 (0x3), region = 93 }
 0x466   :  { %2031 = vsyncpa [#allocation3], 1 }
 0x467   :  { %2033 = vsyncpa [#allocation3 + $0x1], 1 }

</bundles_post_ra>
